<compile_context>
chip_gen: v7x
topology: tpu7x:2x2x1
jax: 0.10.0
libtpu: 0.0.40
codegen_flags: <defaults>
</compile_context>

<pallas_src>
import jax
import jax.numpy as jnp
from jax import lax
from jax.experimental import pallas as pl
from jax.experimental.pallas import tpu as pltpu


M_DTYPE = jnp.bfloat16     # streamed conv-operator tables (halves HBM bytes)
EPS = 1e-5                 # nn.InstanceNorm2d default
SLOPE = 0.01               # nn.LeakyReLU default negative_slope


# ------------------------- fused whole-network kernel ----------------------- #
def _make_fused_generator_kernel(n_layers, eps, slope):
    """refs = (x, M_0..M_{L-1}, S_0..S_{L-2}, Bcast_0..Bcast_{L-2}, out).

    x is (N, F) flat channel-major activations (F = C*H*W).  Each layer is
    x <- x @ M_l; all but the last layer are followed by fused InstanceNorm2d
    (mean already folded into M_l; var via skinny pooling) and LeakyReLU(slope).
    """
    n_norm = n_layers - 1

    def kernel(*refs):
        x_ref = refs[0]
        m_refs = refs[1:1 + n_layers]
        s_refs = refs[1 + n_layers:1 + n_layers + n_norm]
        bc_refs = refs[1 + n_layers + n_norm:1 + n_layers + 2 * n_norm]
        o_ref = refs[-1]

        x = x_ref[...].astype(jnp.float32)
        for l in range(n_layers):
            m = m_refs[l][...]
            # ConvTranspose2d(bias=False) as one lane-dense MXU matmul (bf16 operands,
            # f32 accumulation).  For normalized layers the per-channel spatial mean
            # removal is folded into M' = M @ (I - B), so x comes out zero-mean.
            x = jnp.dot(x.astype(m.dtype), m, preferred_element_type=jnp.float32)
            if l < n_norm:
                # InstanceNorm2d(affine=False, biased var): pool the square with the
                # skinny (F, C) factor, rsqrt on the (N, C) stats, broadcast back with
                # the (C, F) ones factor.  All norm math stays f32.
                var = jnp.dot(x * x, s_refs[l][...],
                              preferred_element_type=jnp.float32)        # (N, C)
                scale = lax.rsqrt(var + eps)                             # (N, C)
                x = x * jnp.dot(scale, bc_refs[l][...],
                                preferred_element_type=jnp.float32)      # (N, F)
                # LeakyReLU(negative_slope=slope)
                x = jnp.where(x >= 0, x, slope * x)
        o_ref[...] = x.astype(o_ref.dtype)

    return kernel


def _fused_generator_call(z_flat, mats, smats, bcmats, eps=EPS, slope=SLOPE,
                          batch_tile=128):
    n, f_in = z_flat.shape
    f_out = mats[-1].shape[1]
    n_layers = len(mats)
    kernel = _make_fused_generator_kernel(n_layers, eps, slope)

    tables = (*mats, *smats, *bcmats)

    # Cost hint: the call is DMA/latency bound; lets XLA overlap surrounding work.
    table_bytes = sum(int(t.size) * t.dtype.itemsize for t in tables)
    io_bytes = int(z_flat.size) * z_flat.dtype.itemsize + n * int(f_out) * 4
    flops = 2 * n * sum(int(t.shape[0]) * int(t.shape[1]) for t in tables)
    cost = pl.CostEstimate(
        flops=flops,
        transcendentals=n * sum(int(s.shape[1]) for s in smats),   # rsqrt per (n, c)
        bytes_accessed=table_bytes + io_bytes)

    if n >= 64 and n % 8 == 0:
        # Large-batch / sampling-loop path: 1-D grid over batch row-tiles; the table
        # BlockSpecs map every step to block (0, 0) so they stay VMEM-resident and the
        # whole table DMA is amortized over all batch tiles.
        tn = batch_tile
        while n % tn != 0:
            tn //= 2
        table_specs = [pl.BlockSpec(t.shape, lambda i: (0, 0)) for t in tables]
        return pl.pallas_call(
            kernel,
            out_shape=jax.ShapeDtypeStruct((n, f_out), jnp.float32),
            grid=(n // tn,),
            in_specs=[pl.BlockSpec((tn, f_in), lambda i: (i, 0)), *table_specs],
            out_specs=pl.BlockSpec((tn, f_out), lambda i: (i, 0)),
            compiler_params=pltpu.CompilerParams(dimension_semantics=("parallel",)),
            cost_estimate=cost,
        )(z_flat, *tables)

    # Tiny-batch path (this demo): single grid-less fused block; every operand lives
    # fully in VMEM (~1.6 MB total, far under the scoped limit on all generations).
    vmem = pl.BlockSpec(memory_space=pltpu.MemorySpace.VMEM)
    return pl.pallas_call(
        kernel,
        out_shape=jax.ShapeDtypeStruct((n, f_out), jnp.float32),
        in_specs=[vmem] * (1 + len(tables)),
        out_specs=vmem,
        cost_estimate=cost,
    )(z_flat, *tables)


# ----------------- precomputed dense operators (wrapper side) ---------------- #
def _conv_transpose_nchw(x, w, stride, padding):
    """ConvTranspose2d(bias=False), NCHW, PyTorch weight layout (Cin, Cout, kh, kw)."""
    kh, kw = w.shape[2], w.shape[3]
    w_flip = jnp.flip(w, axis=(2, 3)).transpose(1, 0, 2, 3)  # (Cout, Cin, kh, kw)
    return lax.conv_general_dilated(
        x, w_flip,
        window_strides=(1, 1),
        padding=((kh - 1 - padding,) * 2, (kw - 1 - padding,) * 2),
        lhs_dilation=(stride, stride),
        dimension_numbers=("NCHW", "OIHW", "NCHW"),
    )


def _dense_deconv_matrix(w, in_hw, stride, padding):
    """Dense operator M (Cin*Hin*Win, Cout*Hout*Wout): flat(y) = flat(x) @ M for
    channel-major (NCHW) flattening, built exactly via conv of an identity basis."""
    cin = w.shape[0]
    hin, win = in_hw
    fin = cin * hin * win
    basis = jnp.eye(fin, dtype=jnp.float32).reshape(fin, cin, hin, win)
    y = _conv_transpose_nchw(basis, w, stride, padding)      # (Fin, Cout, Hout, Wout)
    cout, hout, wout = y.shape[1], y.shape[2], y.shape[3]
    return y.reshape(fin, cout * hout * wout), (cout, hout, wout)


def precompute_generator_tables(params, image_size, z_dim, h_size):
    """Fold each layer's conv-transpose (and, for normalized layers, the InstanceNorm
    mean removal) into one dense matrix, plus skinny variance pooling/broadcast
    factors.  Done once outside the hot path (like weight init)."""
    layer_ws = [params["start"], *params["middle"], params["end"]]
    strides = [1] + [2] * (len(layer_ws) - 1)
    paddings = [0] + [1] * (len(layer_ws) - 1)

    mats, smats, bcmats = [], [], []
    hw = (1, 1)
    chw = None
    for i, (w, s, p) in enumerate(zip(layer_ws, strides, paddings)):
        m, (cout, hout, wout) = _dense_deconv_matrix(w, hw, s, p)
        if i < len(layer_ws) - 1:   # InstanceNorm + LeakyReLU on all but the end layer
            pp = hout * wout
            # Fold mean-centering: M' = M @ (I - B) == per-channel column centering.
            m3 = m.reshape(m.shape[0], cout, pp)
            m = (m3 - jnp.mean(m3, axis=2, keepdims=True)).reshape(m.shape[0], cout * pp)
            # Skinny pooling / broadcast factors (replace the dense F x F block matrix).
            smats.append(jnp.kron(jnp.eye(cout, dtype=jnp.float32),
                                  jnp.full((pp, 1), 1.0 / pp, jnp.float32)))   # (F, C)
            bcmats.append(jnp.kron(jnp.eye(cout, dtype=jnp.float32),
                                   jnp.ones((1, pp), jnp.float32)))            # (C, F)
        mats.append(m.astype(M_DTYPE))
        hw = (hout, wout)
        chw = (cout, hout, wout)

    assert chw == tuple(image_size)
    return {"mats": tuple(mats), "smats": tuple(smats), "bcmats": tuple(bcmats),
            "z_dim": z_dim, "out_chw": chw}


def generator_forward(tables, z):
    """z: (N, z_dim, 1, 1) NCHW -> (N, C, H, W) NCHW, single fused Pallas kernel."""
    n = z.shape[0]
    z_flat = z.reshape(n, -1)                       # channel-major flat (spatial is 1x1)
    out_flat = _fused_generator_call(z_flat, tables["mats"], tables["smats"],
                                     tables["bcmats"])
    c, h, w = tables["out_chw"]
    return out_flat.reshape(n, c, h, w)             # channel-major flat == NCHW view


# ------------------------------- params init -------------------------------- #
def init_generator_params(key, image_size=(4, 16, 16), z_dim=32, h_size=(32, 16, 8)):
    n_channels = image_size[0]
    sh = image_size[1] // 2 ** len(h_size)
    sw = image_size[2] // 2 ** len(h_size)
    keys = jax.random.split(key, len(h_size) + 1)
    params = {}
    # start: ConvTranspose2d(z_dim, h_size[0], kernel=(sh, sw), stride=1, pad=0, bias=False)
    params["start"] = 0.05 * jax.random.normal(
        keys[0], (z_dim, h_size[0], sh, sw), jnp.float32)
    mids = []
    h_bot = h_size[0]
    for i, h_top in enumerate(h_size[1:]):
        # ConvTranspose2d(h_bot, h_top, kernel=4, stride=2, pad=1, bias=False)
        mids.append(0.05 * jax.random.normal(keys[1 + i], (h_bot, h_top, 4, 4), jnp.float32))
        h_bot = h_top
    params["middle"] = tuple(mids)
    # end: ConvTranspose2d(h_bot, n_channels, 4, stride=2, pad=1, bias=False), no norm/act
    params["end"] = 0.05 * jax.random.normal(keys[-1], (h_bot, n_channels, 4, 4), jnp.float32)
    return params


# --------------------------- pure-JAX reference ---------------------------- #
def _ref_layer(x, w, stride, padding, use_norm, use_act, eps=EPS, slope=SLOPE):
    y = _conv_transpose_nchw(x, w, stride, padding)
    if use_norm:
        mean = jnp.mean(y, axis=(2, 3), keepdims=True)
        var = jnp.mean((y - mean) ** 2, axis=(2, 3), keepdims=True)
        y = (y - mean) * lax.rsqrt(var + eps)
    if use_act:
        y = jnp.where(y >= 0, y, slope * y)
    return y


def generator_reference(params, z):
    x = _ref_layer(z, params["start"], 1, 0, True, True)
    for w in params["middle"]:
        x = _ref_layer(x, w, 2, 1, True, True)
    return _ref_layer(x, params["end"], 2, 1, False, False)


# ----------------------------------- main ----------------------------------- #
if __name__ == "__main__":
    image_size = (4, 16, 16)   # (n_channels, H, W)
    z_dim = 32
    h_size = (32, 16, 8)
    batch = 2

    key = jax.random.PRNGKey(0)
    k_params, k_z = jax.random.split(key)
    params = init_generator_params(k_params, image_size, z_dim, h_size)
    tables = precompute_generator_tables(params, image_size, z_dim, h_size)
    z = jax.random.normal(k_z, (batch, z_dim, 1, 1), jnp.float32)

    out = jax.block_until_ready(generator_forward(tables, z))
    assert out.shape == (batch, *image_size), out.shape

    ref = jax.block_until_ready(generator_reference(params, z))
    # Tolerances reflect bf16 storage of the streamed conv-operator tables (with f32
    # tables this design matches the f32 reference to 1e-4).
    max_abs = float(jnp.max(jnp.abs(out - ref)))
    assert jnp.allclose(out, ref, rtol=5e-2, atol=5e-2), max_abs
    rel_l2 = float(jnp.sqrt(jnp.sum((out - ref) ** 2)) / jnp.sqrt(jnp.sum(ref ** 2)))
    assert rel_l2 < 3e-2, (max_abs, rel_l2)

    print("KERNEL_OK")
</pallas_src>

<mosaic_0001>
module attributes {stable_mosaic.version = 11 : i64} {
  func.func @kernel(%arg0: memref<2x32xf32, #tpu.memory_space<vmem>>, %arg1: memref<32x128xbf16, #tpu.memory_space<vmem>>, %arg2: memref<128x256xbf16, #tpu.memory_space<vmem>>, %arg3: memref<256x512xbf16, #tpu.memory_space<vmem>>, %arg4: memref<512x1024xbf16, #tpu.memory_space<vmem>>, %arg5: memref<128x32xf32, #tpu.memory_space<vmem>>, %arg6: memref<256x16xf32, #tpu.memory_space<vmem>>, %arg7: memref<512x8xf32, #tpu.memory_space<vmem>>, %arg8: memref<32x128xf32, #tpu.memory_space<vmem>>, %arg9: memref<16x256xf32, #tpu.memory_space<vmem>>, %arg10: memref<8x512xf32, #tpu.memory_space<vmem>>, %arg11: memref<2x1024xf32, #tpu.memory_space<vmem>>) attributes {dimension_semantics = [], scalar_prefetch = 0 : i64, scratch_operands = 0 : i64, tpu.core_type = #tpu.core_type<tc>} {
    %c0 = arith.constant 0 : index
    %c0_0 = arith.constant 0 : index
    %0 = vector.load %arg0[%c0, %c0_0] : memref<2x32xf32, #tpu.memory_space<vmem>>, vector<2x32xf32>
    %c0_1 = arith.constant 0 : index
    %c0_2 = arith.constant 0 : index
    %1 = vector.load %arg1[%c0_1, %c0_2] : memref<32x128xbf16, #tpu.memory_space<vmem>>, vector<32x128xbf16>
    %2 = arith.truncf %0 : vector<2x32xf32> to vector<2x32xbf16>
    %cst = arith.constant dense<0.000000e+00> : vector<2x128xf32>
    %3 = tpu.matmul %2, %1, %cst {dimension_numbers = #tpu.dot_dimension_numbers<[1], [0], [0], [1], [0, 0, 1, 1], [], []>} : vector<2x32xbf16>, vector<32x128xbf16>, vector<2x128xf32> -> vector<2x128xf32>
    %4 = arith.mulf %3, %3 : vector<2x128xf32>
    %c0_3 = arith.constant 0 : index
    %c0_4 = arith.constant 0 : index
    %5 = vector.load %arg5[%c0_3, %c0_4] : memref<128x32xf32, #tpu.memory_space<vmem>>, vector<128x32xf32>
    %cst_5 = arith.constant dense<0.000000e+00> : vector<2x32xf32>
    %6 = tpu.matmul %4, %5, %cst_5 {dimension_numbers = #tpu.dot_dimension_numbers<[1], [0], [0], [1], [0, 0, 1, 1], [], []>} : vector<2x128xf32>, vector<128x32xf32>, vector<2x32xf32> -> vector<2x32xf32>
    %cst_6 = arith.constant 9.99999974E-6 : f32
    %7 = vector.broadcast %cst_6 : f32 to vector<2x32xf32>
    %8 = arith.addf %6, %7 : vector<2x32xf32>
    %9 = math.rsqrt %8 : vector<2x32xf32>
    %c0_7 = arith.constant 0 : index
    %c0_8 = arith.constant 0 : index
    %10 = vector.load %arg8[%c0_7, %c0_8] : memref<32x128xf32, #tpu.memory_space<vmem>>, vector<32x128xf32>
    %cst_9 = arith.constant dense<0.000000e+00> : vector<2x128xf32>
    %11 = tpu.matmul %9, %10, %cst_9 {dimension_numbers = #tpu.dot_dimension_numbers<[1], [0], [0], [1], [0, 0, 1, 1], [], []>} : vector<2x32xf32>, vector<32x128xf32>, vector<2x128xf32> -> vector<2x128xf32>
    %12 = arith.mulf %3, %11 : vector<2x128xf32>
    %cst_10 = arith.constant 0.000000e+00 : f32
    %13 = vector.broadcast %cst_10 : f32 to vector<2x128xf32>
    %14 = arith.cmpf oge, %12, %13 : vector<2x128xf32>
    %cst_11 = arith.constant 0.00999999977 : f32
    %15 = vector.broadcast %cst_11 : f32 to vector<2x128xf32>
    %16 = arith.mulf %15, %12 : vector<2x128xf32>
    %17 = arith.select %14, %12, %16 : vector<2x128xi1>, vector<2x128xf32>
    %c0_12 = arith.constant 0 : index
    %c0_13 = arith.constant 0 : index
    %18 = vector.load %arg2[%c0_12, %c0_13] : memref<128x256xbf16, #tpu.memory_space<vmem>>, vector<128x256xbf16>
    %19 = arith.truncf %17 : vector<2x128xf32> to vector<2x128xbf16>
    %cst_14 = arith.constant dense<0.000000e+00> : vector<2x256xf32>
    %20 = tpu.matmul %19, %18, %cst_14 {dimension_numbers = #tpu.dot_dimension_numbers<[1], [0], [0], [1], [0, 0, 1, 1], [], []>} : vector<2x128xbf16>, vector<128x256xbf16>, vector<2x256xf32> -> vector<2x256xf32>
    %21 = arith.mulf %20, %20 : vector<2x256xf32>
    %c0_15 = arith.constant 0 : index
    %c0_16 = arith.constant 0 : index
    %22 = vector.load %arg6[%c0_15, %c0_16] : memref<256x16xf32, #tpu.memory_space<vmem>>, vector<256x16xf32>
    %cst_17 = arith.constant dense<0.000000e+00> : vector<2x16xf32>
    %23 = tpu.matmul %21, %22, %cst_17 {dimension_numbers = #tpu.dot_dimension_numbers<[1], [0], [0], [1], [0, 0, 1, 1], [], []>} : vector<2x256xf32>, vector<256x16xf32>, vector<2x16xf32> -> vector<2x16xf32>
    %cst_18 = arith.constant 9.99999974E-6 : f32
    %24 = vector.broadcast %cst_18 : f32 to vector<2x16xf32>
    %25 = arith.addf %23, %24 : vector<2x16xf32>
    %26 = math.rsqrt %25 : vector<2x16xf32>
    %c0_19 = arith.constant 0 : index
    %c0_20 = arith.constant 0 : index
    %27 = vector.load %arg9[%c0_19, %c0_20] : memref<16x256xf32, #tpu.memory_space<vmem>>, vector<16x256xf32>
    %cst_21 = arith.constant dense<0.000000e+00> : vector<2x256xf32>
    %28 = tpu.matmul %26, %27, %cst_21 {dimension_numbers = #tpu.dot_dimension_numbers<[1], [0], [0], [1], [0, 0, 1, 1], [], []>} : vector<2x16xf32>, vector<16x256xf32>, vector<2x256xf32> -> vector<2x256xf32>
    %29 = arith.mulf %20, %28 : vector<2x256xf32>
    %cst_22 = arith.constant 0.000000e+00 : f32
    %30 = vector.broadcast %cst_22 : f32 to vector<2x256xf32>
    %31 = arith.cmpf oge, %29, %30 : vector<2x256xf32>
    %cst_23 = arith.constant 0.00999999977 : f32
    %32 = vector.broadcast %cst_23 : f32 to vector<2x256xf32>
    %33 = arith.mulf %32, %29 : vector<2x256xf32>
    %34 = arith.select %31, %29, %33 : vector<2x256xi1>, vector<2x256xf32>
    %c0_24 = arith.constant 0 : index
    %c0_25 = arith.constant 0 : index
    %35 = vector.load %arg3[%c0_24, %c0_25] : memref<256x512xbf16, #tpu.memory_space<vmem>>, vector<256x512xbf16>
    %36 = arith.truncf %34 : vector<2x256xf32> to vector<2x256xbf16>
    %cst_26 = arith.constant dense<0.000000e+00> : vector<2x512xf32>
    %37 = tpu.matmul %36, %35, %cst_26 {dimension_numbers = #tpu.dot_dimension_numbers<[1], [0], [0], [1], [0, 0, 1, 1], [], []>} : vector<2x256xbf16>, vector<256x512xbf16>, vector<2x512xf32> -> vector<2x512xf32>
    %38 = arith.mulf %37, %37 : vector<2x512xf32>
    %c0_27 = arith.constant 0 : index
    %c0_28 = arith.constant 0 : index
    %39 = vector.load %arg7[%c0_27, %c0_28] : memref<512x8xf32, #tpu.memory_space<vmem>>, vector<512x8xf32>
    %cst_29 = arith.constant dense<0.000000e+00> : vector<2x8xf32>
    %40 = tpu.matmul %38, %39, %cst_29 {dimension_numbers = #tpu.dot_dimension_numbers<[1], [0], [0], [1], [0, 0, 1, 1], [], []>} : vector<2x512xf32>, vector<512x8xf32>, vector<2x8xf32> -> vector<2x8xf32>
    %cst_30 = arith.constant 9.99999974E-6 : f32
    %41 = vector.broadcast %cst_30 : f32 to vector<2x8xf32>
    %42 = arith.addf %40, %41 : vector<2x8xf32>
    %43 = math.rsqrt %42 : vector<2x8xf32>
    %c0_31 = arith.constant 0 : index
    %c0_32 = arith.constant 0 : index
    %44 = vector.load %arg10[%c0_31, %c0_32] : memref<8x512xf32, #tpu.memory_space<vmem>>, vector<8x512xf32>
    %cst_33 = arith.constant dense<0.000000e+00> : vector<2x512xf32>
    %45 = tpu.matmul %43, %44, %cst_33 {dimension_numbers = #tpu.dot_dimension_numbers<[1], [0], [0], [1], [0, 0, 1, 1], [], []>} : vector<2x8xf32>, vector<8x512xf32>, vector<2x512xf32> -> vector<2x512xf32>
    %46 = arith.mulf %37, %45 : vector<2x512xf32>
    %cst_34 = arith.constant 0.000000e+00 : f32
    %47 = vector.broadcast %cst_34 : f32 to vector<2x512xf32>
    %48 = arith.cmpf oge, %46, %47 : vector<2x512xf32>
    %cst_35 = arith.constant 0.00999999977 : f32
    %49 = vector.broadcast %cst_35 : f32 to vector<2x512xf32>
    %50 = arith.mulf %49, %46 : vector<2x512xf32>
    %51 = arith.select %48, %46, %50 : vector<2x512xi1>, vector<2x512xf32>
    %c0_36 = arith.constant 0 : index
    %c0_37 = arith.constant 0 : index
    %52 = vector.load %arg4[%c0_36, %c0_37] : memref<512x1024xbf16, #tpu.memory_space<vmem>>, vector<512x1024xbf16>
    %53 = arith.truncf %51 : vector<2x512xf32> to vector<2x512xbf16>
    %cst_38 = arith.constant dense<0.000000e+00> : vector<2x1024xf32>
    %54 = tpu.matmul %53, %52, %cst_38 {dimension_numbers = #tpu.dot_dimension_numbers<[1], [0], [0], [1], [0, 0, 1, 1], [], []>} : vector<2x512xbf16>, vector<512x1024xbf16>, vector<2x1024xf32> -> vector<2x1024xf32>
    %c0_39 = arith.constant 0 : index
    %c0_40 = arith.constant 0 : index
    %55 = vector.load %arg11[%c0_39, %c0_40] : memref<2x1024xf32, #tpu.memory_space<vmem>>, vector<2x1024xf32>
    tpu.vector_store %arg11[%c0_39, %c0_40], %54 {strides = array<i32>} : memref<2x1024xf32, #tpu.memory_space<vmem>>, vector<2x1024xf32>,
    return
  }
}

</mosaic_0001>

<bundles_post_ra>
// kernel: tpu_custom_call.1
= control target key start
LH: loop header
LB: loop body
LE: loop exit
PB: predicated region body
PF: predicated region fallthrough
CT: control target
= control target key end

     0   :  { %16 = vsyncpa [#allocation3], 0  ;;  %s5046_s0 = inlined_call_operand.vmem [shape: f32[2,32], index: 0, kind: input, shape index: {}]   ;;  %s5047_s1 = inlined_call_operand.vmem [shape: bf16[32,128], index: 1, kind: input, shape index: {}]   ;;  %s5048_s2 = inlined_call_operand.vmem [shape: bf16[128,256], index: 2, kind: input, shape index: {}]   ;;  %s5049_s3 = inlined_call_operand.vmem [shape: bf16[256,512], index: 3, kind: input, shape index: {}]   ;;  %s5050_s4 = inlined_call_operand.hbm [shape: bf16[512,1024], index: 4, kind: input, shape index: {}]   ;;  %s5051_s5 = inlined_call_operand.vmem [shape: f32[128,32], index: 5, kind: input, shape index: {}]   ;;  %s5052_s6 = inlined_call_operand.vmem [shape: f32[256,16], index: 6, kind: input, shape index: {}]   ;;  %s5053_s7 = inlined_call_operand.vmem [shape: f32[512,8], index: 7, kind: input, shape index: {}]   ;;  %s5054_s8 = inlined_call_operand.vmem [shape: f32[32,128], index: 8, kind: input, shape index: {}]   ;;  %s5055_s9 = inlined_call_operand.vmem [shape: f32[16,256], index: 9, kind: input, shape index: {}]   ;;  %s5056_s10 = inlined_call_operand.vmem [shape: f32[8,512], index: 10, kind: input, shape index: {}]   ;;  %s5057_s11 = inlined_call_operand.hbm [shape: f32[2,1024], index: 11, kind: output, shape index: {}]  }
   0x1   :  { %17 = vsyncpa [#allocation4], 0  ;;  %s4245_s17 = smov [#allocation2]   ;;  %s4197_s21 = scalar_lea.hbm %s5050_s4, 32768 }
   0x2   :  { %s31_s18 = sshll.u32 %s4245_s17, 4  ;;  %p4198_p0 = scmp.ne.s32.totalorder %s5050_s4, %s4197_s21  ;;  %s32_s18 = int_to_ptr.vmem [resolvable:$true] %s31_s18 }
   0x3   :  { %p4201_p1 = scmp.lt.u32.totalorder %s4197_s21, %s5050_s4 }
   0x5   :  { %p4203_p2 = pnand %p4201_p1, %p4198_p0 }
   0x7   :  { %4206 = shalt.err (!%p4203_p2)
}
   0x8   :  { %s4207_s26 = scalar_lea.vmem %s32_s18, 32768  ;;  %p4212_p4 = scmp.lt.s32.totalorder %s32_s18, %s32_s18 }
   0x9   :  { %p4208_p3 = scmp.ne.s32.totalorder %s32_s18, %s4207_s26  ;;  %p4213_p5 = scmp.lt.s32.totalorder %s4207_s26, %s4207_s26 }
   0xb   :  { %p4214_p6 = por %p4213_p5, %p4212_p4 }
   0xd   :  { %p4215_p7 = pnand %p4214_p6, %p4208_p3 }
   0xf   :  { %4218 = shalt.err (!%p4215_p7)
}
  0x10   :  { %s4246_s27 = smov 512   ;;  %s4247_s28 = smov 32  }
  0x11   :  { %37 = dma.hbm_to_vmem [thread:$0]  %s5050_s4, 32768, %s32_s18, [#allocation3], %s4246_s27, %s4246_s27, %s4247_s28  }
  0x12   :  { %4241 = dma.done.wait [#allocation3], 32768  }
  0x13   :  { %4242 = vsyncadd [#allocation3], 4294934528  ;;  %v4248_v0 = vmov 0.0   ;;  %vm4249_vm0 = vmmov 0   ;;  %v4250_v1 = vmov 0.0|0.0   ;;  %v4069_v2 = vld [vmem:[%s5047_s1] sm:$0xff]  }
  0x14   :  { %3860 = vmatprep.subr.bf16.mxu0 %v4248_v0  ;;  %3864 = vmatprep.mubr.msk.bf16.mxu0 %vm4249_vm0, %v4248_v0  ;;  %v4070_v3 = vld [vmem:[%s5047_s1 + $0x8] sm:$0xff]   ;;  %v54_v4 = vld [vmem:[%s5046_s0] sm:$0x3]  ;;  %v119_v8 = vld [vmem:[%s5051_s5 + $0x10] sm:$0xff]  ;;  %vm72_vm1 = vcmask 261120   ;;  %v4251_v61 = vmov 0  }
  0x15   :  { %3914 = vmatprep.subr.bf16.mxu1 %v4250_v1  ;;  %3900 = vmatprep.mubr.msk.f32.mxu1 %vm4249_vm0, %v4248_v0  ;;  %v117_v5 = vld [vmem:[%s5051_s5] sm:$0xff]  ;;  %v118_v6 = vld [vmem:[%s5051_s5 + $0x8] sm:$0xff]  ;;  %v120_v9 = vld [vmem:[%s5051_s5 + $0x18] sm:$0xff]  ;;  %v59_v10 = vpack.c.bf16 %v54_v4, %v54_v4  ;;  %vm532_vm3 = vcmask 130048   ;;  %vm1296_vm6 = vcmask 64512  }
  0x16   :  { %3861 = vmatpush3.bf16.msra.mxu0 %v4069_v2  ;;  %v3915_v7 = vpack.c.bf16 %v118_v6, %v117_v5  ;;  %v3918_v11 = vpack.c.bf16 %v120_v9, %v119_v8  ;;  %v121_v12 = vld [vmem:[%s5051_s5 + $0x20] sm:$0xff]  ;;  %v122_v13 = vld [vmem:[%s5051_s5 + $0x28] sm:$0xff]  ;;  %v123_v14 = vld [vmem:[%s5051_s5 + $0x30] sm:$0xff] }
  0x17   :  { %3862 = vmatprep.subr.bf16.mxu0 %v4248_v0  ;;  %v124_v15 = vld [vmem:[%s5051_s5 + $0x38] sm:$0xff]  ;;  %v3921_v16 = vpack.c.bf16 %v122_v13, %v121_v12  ;;  %v125_v17 = vld [vmem:[%s5051_s5 + $0x40] sm:$0xff]  ;;  %v126_v18 = vld [vmem:[%s5051_s5 + $0x48] sm:$0xff] }
  0x18   :  { %3916 = vmatpush3.bf16.msra.mxu1 %v3915_v7  ;;  %v3924_v19 = vpack.c.bf16 %v124_v15, %v123_v14  ;;  %v127_v20 = vld [vmem:[%s5051_s5 + $0x50] sm:$0xff]  ;;  %v128_v21 = vld [vmem:[%s5051_s5 + $0x58] sm:$0xff]  ;;  %v3927_v22 = vpack.c.bf16 %v126_v18, %v125_v17  ;;  %v129_v23 = vld [vmem:[%s5051_s5 + $0x60] sm:$0xff] }
  0x19   :  { %3917 = vmatprep.subr.bf16.mxu1 %v4250_v1  ;;  %v130_v24 = vld [vmem:[%s5051_s5 + $0x68] sm:$0xff]  ;;  %v3930_v25 = vpack.c.bf16 %v128_v21, %v127_v20  ;;  %v131_v27 = vld [vmem:[%s5051_s5 + $0x70] sm:$0xff]  ;;  %v132_v28 = vld [vmem:[%s5051_s5 + $0x78] sm:$0xff] }
  0x1a   :  { %3863 = vmatpush3.bf16.msra.mxu0 %v4070_v3  ;;  %v3933_v26 = vpack.c.bf16 %v130_v24, %v129_v23  ;;  %v3936_v29 = vpack.c.bf16 %v132_v28, %v131_v27  ;;  %v204_v35 = vld [vmem:[%s5054_s8] sm:$0xff]  ;;  %v205_v36 = vld [vmem:[%s5054_s8 + $0x8] sm:$0xff]  ;;  %v206_v37 = vld [vmem:[%s5054_s8 + $0x10] sm:$0xff] }
  0x1b   :  { %3938 = vmatprep.subr.bf16.mxu0 %v4250_v1  ;;  %v3939_v38 = vpack.c.bf16 %v205_v36, %v204_v35  ;;  %v207_v39 = vld [vmem:[%s5054_s8 + $0x18] sm:$0xff]  ;;  %v4073_v41 = vld [vmem:[%s5048_s2 + $0x4] ss:$8 sps:$4 sm:$0xff]   ;;  %v4071_v45 = vld [vmem:[%s5048_s2] ss:$8 sps:$4 sm:$0xff]  }
  0x1c   :  { %3919 = vmatpush3.bf16.msra.mxu1 %v3918_v11  ;;  %v3942_v40 = vpack.c.bf16 %v207_v39, %v206_v37  ;;  %v4076_v46 = vld [vmem:[%s5048_s2 + $0x14] ss:$8 sps:$4 sm:$0xff]   ;;  %v4074_v48 = vld [vmem:[%s5048_s2 + $0x10] ss:$8 sps:$4 sm:$0xff]   ;;  %v4079_v49 = vld [vmem:[%s5048_s2 + $0x24] ss:$8 sps:$4 sm:$0xff]  }
  0x1d   :  { %3865 = vmatmul.mubr.msk.bf16.vlgmr.msra.gmra.mrb[0].mxu0 %vm72_vm1, %v59_v10  ;;  %3920 = vmatprep.subr.bf16.mxu1 %v4250_v1  ;;  %v4077_v50 = vld [vmem:[%s5048_s2 + $0x20] ss:$8 sps:$4 sm:$0xff]   ;;  %v4082_v51 = vld [vmem:[%s5048_s2 + $0x34] ss:$8 sps:$4 sm:$0xff]   ;;  %v4080_v52 = vld [vmem:[%s5048_s2 + $0x30] ss:$8 sps:$4 sm:$0xff]  }
  0x1e   :  { %3911 = vmatprep.mubr.msk.f32.mxu0 %vm4249_vm0, %v4248_v0  ;;  %3940 = vmatpush3.bf16.msra.mxu0 %v3939_v38  ;;  %v4085_v53 = vld [vmem:[%s5048_s2 + $0x44] ss:$8 sps:$4 sm:$0xff]   ;;  %v4083_v54 = vld [vmem:[%s5048_s2 + $0x40] ss:$8 sps:$4 sm:$0xff]   ;;  %v4088_v55 = vld [vmem:[%s5048_s2 + $0x54] ss:$8 sps:$4 sm:$0xff]  }
  0x1f   :  { %3941 = vmatprep.subr.bf16.mxu0 %v4250_v1  ;;  %v4086_v56 = vld [vmem:[%s5048_s2 + $0x50] ss:$8 sps:$4 sm:$0xff]   ;;  %v4091_v57 = vld [vmem:[%s5048_s2 + $0x64] ss:$8 sps:$4 sm:$0xff]   ;;  %v4089_v58 = vld [vmem:[%s5048_s2 + $0x60] ss:$8 sps:$4 sm:$0xff]  }
  0x20   :  { %3922 = vmatpush3.bf16.msra.mxu1 %v3921_v16  ;;  %v4094_v59 = vld [vmem:[%s5048_s2 + $0x74] ss:$8 sps:$4 sm:$0xff]   ;;  %v4092_v60 = vld [vmem:[%s5048_s2 + $0x70] ss:$8 sps:$4 sm:$0xff]   ;;  %v441_v62 = vld [vmem:[%s5052_s6 + $0x80] sm:$0xff] }
  0x21   :  { %3923 = vmatprep.subr.bf16.mxu1 %v4250_v1  ;;  %v442_v63 = vld [vmem:[%s5052_s6 + $0x88] sm:$0xff]  ;;  %v443_v4 = vld [vmem:[%s5052_s6 + $0x90] sm:$0xff]  ;;  %v444_v5 = vld [vmem:[%s5052_s6 + $0x98] sm:$0xff] }
  0x22   :  { %3943 = vmatpush3.bf16.msra.mxu0 %v3942_v40  ;;  %v3944_v2 = vpack.c.bf16 %v442_v63, %v441_v62  ;;  %v426_v3 = vld [vmem:[%s5052_s6 + $0x8] sm:$0xff]  ;;  %v3948_v7 = vpack.c.bf16 %v444_v5, %v443_v4  ;;  %v427_v8 = vld [vmem:[%s5052_s6 + $0x10] sm:$0xff]  ;;  %v428_v9 = vld [vmem:[%s5052_s6 + $0x18] sm:$0xff] }
  0x23   :  { %382 = vmatprep.subr.bf16.mxu0 %v4073_v41  ;;  %v445_v10 = vld [vmem:[%s5052_s6 + $0xa0] sm:$0xff]  ;;  %v446_v11 = vld [vmem:[%s5052_s6 + $0xa8] sm:$0xff]  ;;  %v3950_v12 = vpack.c.bf16 %v428_v9, %v427_v8  ;;  %v447_v16 = vld [vmem:[%s5052_s6 + $0xb0] sm:$0xff] }
  0x24   :  { %3925 = vmatpush3.bf16.msra.mxu1 %v3924_v19  ;;  %v3952_v13 = vpack.c.bf16 %v446_v11, %v445_v10  ;;  %v429_v14 = vld [vmem:[%s5052_s6 + $0x20] sm:$0xff]  ;;  %v430_v15 = vld [vmem:[%s5052_s6 + $0x28] sm:$0xff]  ;;  %v448_v17 = vld [vmem:[%s5052_s6 + $0xb8] sm:$0xff] }
  0x25   :  { %3926 = vmatprep.subr.bf16.mxu1 %v4250_v1  ;;  %v3954_v18 = vpack.c.bf16 %v430_v15, %v429_v14  ;;  %v3956_v19 = vpack.c.bf16 %v448_v17, %v447_v16  ;;  %v431_v20 = vld [vmem:[%s5052_s6 + $0x30] sm:$0xff]  ;;  %v432_v21 = vld [vmem:[%s5052_s6 + $0x38] sm:$0xff]  ;;  %v450_v23 = vld [vmem:[%s5052_s6 + $0xc8] sm:$0xff] }
  0x26   :  { %v3958_v24 = vpack.c.bf16 %v432_v21, %v431_v20  ;;  %v434_v27 = vld [vmem:[%s5052_s6 + $0x48] sm:$0xff]  ;;  %v451_v28 = vld [vmem:[%s5052_s6 + $0xd0] sm:$0xff]  ;;  %v453_v35 = vld [vmem:[%s5052_s6 + $0xe0] sm:$0xff] }
  0x27   :  { %v454_v36 = vld [vmem:[%s5052_s6 + $0xe8] sm:$0xff]  ;;  %v437_v39 = vld [vmem:[%s5052_s6 + $0x60] sm:$0xff]  ;;  %v530_v63 = vld [vmem:[%s5055_s9 + $0x10] sm:$0xff] }
  0x28   :  { %3928 = vmatpush3.bf16.msra.mxu1 %v3927_v22  ;;  %v449_v22 = vld [vmem:[%s5052_s6 + $0xc0] sm:$0xff]  ;;  %v3968_v38 = vpack.c.bf16 %v454_v36, %v453_v35  ;;  %v438_v40 = vld [vmem:[%s5052_s6 + $0x68] sm:$0xff] }
  0x29   :  { %3929 = vmatprep.subr.bf16.mxu1 %v4250_v1  ;;  %v3970_v41 = vpack.c.bf16 %v438_v40, %v437_v39  ;;  %v4100_v4 = vld [vmem:[%s5049_s3 + $0xc] ss:$16 sps:$4 sm:$0xff]   ;;  %v4110_v8 = vld [vmem:[%s5049_s3 + $0x48] ss:$16 sps:$4 sm:$0xff]   ;;  %v4095_v36 = vld [vmem:[%s5049_s3] ss:$16 sps:$4 sm:$0xff]  }
  0x2a   :  { %v4106_v5 = vld [vmem:[%s5049_s3 + $0x2c] ss:$16 sps:$4 sm:$0xff]   ;;  %v4116_v10 = vld [vmem:[%s5049_s3 + $0x68] ss:$16 sps:$4 sm:$0xff]   ;;  %v4101_v39 = vld [vmem:[%s5049_s3 + $0x20] ss:$16 sps:$4 sm:$0xff]  }
  0x2b   :  { %v4118_v9 = vld [vmem:[%s5049_s3 + $0x6c] ss:$16 sps:$4 sm:$0xff]   ;;  %v4128_v14 = vld [vmem:[%s5049_s3 + $0xa8] ss:$16 sps:$4 sm:$0xff]   ;;  %v4109_v40 = vld [vmem:[%s5049_s3 + $0x44] ss:$16 sps:$4 sm:$0xff]  }
  0x2c   :  { %3931 = vmatpush3.bf16.msra.mxu1 %v3930_v25  ;;  %v3960_v25 = vpack.c.bf16 %v450_v23, %v449_v22  ;;  %v4124_v11 = vld [vmem:[%s5049_s3 + $0x8c] ss:$16 sps:$4 sm:$0xff]   ;;  %v4134_v16 = vld [vmem:[%s5049_s3 + $0xc8] ss:$16 sps:$4 sm:$0xff]  }
  0x2d   :  { %3932 = vmatprep.subr.bf16.mxu1 %v4250_v1  ;;  %v4136_v15 = vld [vmem:[%s5049_s3 + $0xcc] ss:$16 sps:$4 sm:$0xff]   ;;  %v4146_v20 = vld [vmem:[%s5049_s3 + $0x108] ss:$16 sps:$4 sm:$0xff]  }
  0x2e   :  { %v4142_v17 = vld [vmem:[%s5049_s3 + $0xec] ss:$16 sps:$4 sm:$0xff]   ;;  %v4152_v22 = vld [vmem:[%s5049_s3 + $0x128] ss:$16 sps:$4 sm:$0xff]  }
  0x2f   :  { %v4154_v21 = vld [vmem:[%s5049_s3 + $0x12c] ss:$16 sps:$4 sm:$0xff]  }
  0x30   :  { %3934 = vmatpush3.bf16.msra.mxu1 %v3933_v26  ;;  %v433_v26 = vld [vmem:[%s5052_s6 + $0x40] sm:$0xff]  ;;  %v4160_v23 = vld [vmem:[%s5049_s3 + $0x14c] ss:$16 sps:$4 sm:$0xff]  }
  0x31   :  { %3935 = vmatprep.subr.bf16.mxu1 %v4250_v1  ;;  %v425_v1 = vld [vmem:[%s5052_s6] sm:$0xff] }
  0x32   :  { %v3946_v6 = vpack.c.bf16 %v426_v3, %v425_v1  ;;  %v4098_v3 = vld [vmem:[%s5049_s3 + $0x8] ss:$16 sps:$4 sm:$0xff]  }
  0x34   :  { %3937 = vmatpush3.bf16.msra.mxu1 %v3936_v29  ;;  %v452_v29 = vld [vmem:[%s5052_s6 + $0xd8] sm:$0xff] }
  0x35   :  { %3945 = vmatprep.subr.bf16.mxu1 %v3944_v2  ;;  %v4097_v2 = vld [vmem:[%s5049_s3 + $0x4] ss:$16 sps:$4 sm:$0xff]  }
  0xf0   :  { %v4401_v30 = vpop.f32.mrb[0].mxu0 }
  0xf1   :  { %v116_v31 = vmul.f32 %v4401_v30, %v4401_v30  ;;  %v3866_v32 = vpop.f32.mrb[1].mxu0 }
  0xf2   :  { %v113_v33 = vpop.f32.mrb[2].mxu0  ;;  %v3964_v32 = vpack.c.bf16 %v452_v29, %v451_v28  ;;  %v4170_v28 = vld [vmem:[%s5049_s3 + $0x188] ss:$16 sps:$4 sm:$0xff]   ;;  %v4178_v29 = vld [vmem:[%s5049_s3 + $0x1ac] ss:$16 sps:$4 sm:$0xff]  }
  0xf3   :  { %v3867_v34 = vpop.f32.mrb[3].mxu0  ;;  %3901 = vmatmul.mubr.f32.vlgmr.msra.gmra.mrb[0].mxu1 %v116_v31  ;;  %v3962_v31 = vpack.c.bf16 %v434_v27, %v433_v26  ;;  %v435_v33 = vld [vmem:[%s5052_s6 + $0x50] sm:$0xff]  ;;  %v4164_v26 = vld [vmem:[%s5049_s3 + $0x168] ss:$16 sps:$4 sm:$0xff]   ;;  %v4172_v27 = vld [vmem:[%s5049_s3 + $0x18c] ss:$16 sps:$4 sm:$0xff]  }
  0xf4   :  { %3947 = vmatpush3.bf16.msra.mxu1 %v3946_v6  ;;  %v436_v34 = vld [vmem:[%s5052_s6 + $0x58] sm:$0xff] }
  0xf5   :  { %3949 = vmatprep.subr.bf16.mxu1 %v3948_v7  ;;  %v3966_v37 = vpack.c.bf16 %v436_v34, %v435_v33  ;;  %v4104_v6 = vld [vmem:[%s5049_s3 + $0x28] ss:$16 sps:$4 sm:$0xff]   ;;  %v4112_v7 = vld [vmem:[%s5049_s3 + $0x4c] ss:$16 sps:$4 sm:$0xff]  }
  0xf8   :  { %3951 = vmatpush3.bf16.msra.mxu1 %v3950_v12  ;;  %v4122_v12 = vld [vmem:[%s5049_s3 + $0x88] ss:$16 sps:$4 sm:$0xff]  }
  0xf9   :  { %3953 = vmatprep.subr.bf16.mxu1 %v3952_v13  ;;  %v4130_v13 = vld [vmem:[%s5049_s3 + $0xac] ss:$16 sps:$4 sm:$0xff]  }
  0xfc   :  { %3955 = vmatpush3.bf16.msra.mxu1 %v3954_v18  ;;  %v4140_v18 = vld [vmem:[%s5049_s3 + $0xe8] ss:$16 sps:$4 sm:$0xff]  }
  0xfd   :  { %3957 = vmatprep.subr.bf16.mxu1 %v3956_v19  ;;  %v4148_v19 = vld [vmem:[%s5049_s3 + $0x10c] ss:$16 sps:$4 sm:$0xff]  }
 0x100   :  { %3959 = vmatpush3.bf16.msra.mxu1 %v3958_v24  ;;  %v4158_v24 = vld [vmem:[%s5049_s3 + $0x148] ss:$16 sps:$4 sm:$0xff]  }
 0x101   :  { %3961 = vmatprep.subr.bf16.mxu1 %v3960_v25  ;;  %v4166_v25 = vld [vmem:[%s5049_s3 + $0x16c] ss:$16 sps:$4 sm:$0xff]  }
 0x104   :  { %3963 = vmatpush3.bf16.msra.mxu1 %v3962_v31  ;;  %v4176_v31 = vld [vmem:[%s5049_s3 + $0x1a8] ss:$16 sps:$4 sm:$0xff]  }
 0x105   :  { %3965 = vmatprep.subr.bf16.mxu1 %v3964_v32 }
 0x108   :  { %3967 = vmatpush3.bf16.msra.mxu1 %v3966_v37  ;;  %v4103_v37 = vld [vmem:[%s5049_s3 + $0x24] ss:$16 sps:$4 sm:$0xff]  }
 0x109   :  { %3969 = vmatprep.subr.bf16.mxu1 %v3968_v38 }
 0x10c   :  { %3971 = vmatpush3.bf16.msra.mxu1 %v3970_v41  ;;  %v4107_v41 = vld [vmem:[%s5049_s3 + $0x40] ss:$16 sps:$4 sm:$0xff]  }
 0x1c6   :  { %v199_v42 = vpop.f32.mrb[0].mxu1 }
 0x1c7   :  { %v200_v43 = vadd.f32 1e-05, %v199_v42  ;;  %v3902_v44 = vpop.f32.mrb[1].mxu1 }
 0x1c9   :  { %4191 = vrsqrt.f32 %v200_v43 }
 0x1d3   :  { %v4192_v47 = vpop.eup %4191 }
 0x1d4   :  { %3912 = vmatmul.mubr.msk.f32.vlgmr.msra.gmra.mrb[4].mxu0 %vm72_vm1, %v4192_v47 }
 0x1d5   :  { %383 = vmatpush1.bf16.msra.mxu0 %v4071_v45  ;;  %414 = vmatprep.mubr.bf16.mxu0 %v4251_v61  ;;  %v528_v61 = vld [vmem:[%s5055_s9] sm:$0xff] }
 0x1d6   :  { %384 = vmatprep.subr.bf16.mxu0 %v4076_v46  ;;  %v3978_v1 = vpack.c.bf16 %v530_v63, %v528_v61  ;;  %v4169_v61 = vld [vmem:[%s5049_s3 + $0x184] ss:$16 sps:$4 sm:$0xff]  }
 0x1d7   :  { %v4175_v63 = vld [vmem:[%s5049_s3 + $0x1a4] ss:$16 sps:$4 sm:$0xff]  }
 0x1d9   :  { %385 = vmatpush1.bf16.msra.mxu0 %v4074_v48  ;;  %v455_v48 = vld [vmem:[%s5052_s6 + $0xf0] sm:$0xff] }
 0x1da   :  { %386 = vmatprep.subr.bf16.mxu0 %v4079_v49  ;;  %v456_v49 = vld [vmem:[%s5052_s6 + $0xf8] sm:$0xff] }
 0x1dd   :  { %387 = vmatpush1.bf16.msra.mxu0 %v4077_v50  ;;  %v3972_v50 = vpack.c.bf16 %v456_v49, %v455_v48  ;;  %v4133_v48 = vld [vmem:[%s5049_s3 + $0xc4] ss:$16 sps:$4 sm:$0xff]   ;;  %v4131_v49 = vld [vmem:[%s5049_s3 + $0xc0] ss:$16 sps:$4 sm:$0xff]  }
 0x1de   :  { %388 = vmatprep.subr.bf16.mxu0 %v4082_v51  ;;  %v440_v51 = vld [vmem:[%s5052_s6 + $0x78] sm:$0xff] }
 0x1df   :  { %3973 = vmatprep.subr.bf16.mxu1 %v3972_v50  ;;  %v4139_v50 = vld [vmem:[%s5049_s3 + $0xe4] ss:$16 sps:$4 sm:$0xff]  }
 0x1e1   :  { %389 = vmatpush1.bf16.msra.mxu0 %v4080_v52 }
 0x1e2   :  { %390 = vmatprep.subr.bf16.mxu0 %v4085_v53 }
 0x1e5   :  { %391 = vmatpush1.bf16.msra.mxu0 %v4083_v54 }
 0x1e6   :  { %392 = vmatprep.subr.bf16.mxu0 %v4088_v55 }
 0x1e9   :  { %393 = vmatpush1.bf16.msra.mxu0 %v4086_v56 }
 0x1ea   :  { %394 = vmatprep.subr.bf16.mxu0 %v4091_v57 }
 0x1ed   :  { %395 = vmatpush1.bf16.msra.mxu0 %v4089_v58 }
 0x1ee   :  { %396 = vmatprep.subr.bf16.mxu0 %v4094_v59  ;;  %v529_v59 = vld [vmem:[%s5055_s9 + $0x8] sm:$0xff] }
 0x1f1   :  { %397 = vmatpush1.bf16.msra.mxu0 %v4092_v60  ;;  %v531_v60 = vld [vmem:[%s5055_s9 + $0x18] sm:$0xff] }
 0x1f2   :  { %v3976_v62 = vpack.c.bf16 %v531_v60, %v529_v59  ;;  %v4163_v59 = vld [vmem:[%s5049_s3 + $0x164] ss:$16 sps:$4 sm:$0xff]   ;;  %v4161_v60 = vld [vmem:[%s5049_s3 + $0x160] ss:$16 sps:$4 sm:$0xff]  }
 0x1f4   :  { %3977 = vmatprep.subr.bf16.mxu0 %v3976_v62  ;;  %v4167_v62 = vld [vmem:[%s5049_s3 + $0x180] ss:$16 sps:$4 sm:$0xff]  }
 0x2a7   :  { %v277_v42 = vpop.f32.mrb[4].mxu0 }
 0x2a8   :  { %v281_v43 = vmul.f32 %v277_v42, %v4401_v30  ;;  %v3913_v44 = vpop.f32.mrb[5].mxu0  ;;  %v439_v30 = vld [vmem:[%s5052_s6 + $0x70] sm:$0xff] }
 0x2a9   :  { %v3974_v52 = vpack.c.bf16 %v440_v51, %v439_v30  ;;  %v4115_v42 = vld [vmem:[%s5049_s3 + $0x64] ss:$16 sps:$4 sm:$0xff]   ;;  %v4137_v30 = vld [vmem:[%s5049_s3 + $0xe0] ss:$16 sps:$4 sm:$0xff]  }
 0x2aa   :  { %vm282_vm2 = vcmp.ge.f32.partialorder %v281_v43, 0.0  ;;  %v283_v45 = vmul.f32 0.01, %v281_v43  ;;  %v4121_v44 = vld [vmem:[%s5049_s3 + $0x84] ss:$16 sps:$4 sm:$0xff]  }
 0x2ab   :  { %3975 = vmatpush3.bf16.msra.mxu1 %v3974_v52  ;;  %v4145_v51 = vld [vmem:[%s5049_s3 + $0x104] ss:$16 sps:$4 sm:$0xff]   ;;  %v4143_v52 = vld [vmem:[%s5049_s3 + $0x100] ss:$16 sps:$4 sm:$0xff]  }
 0x2ac   :  { %v284_v46 = vsel %vm282_vm2, %v281_v43, %v283_v45  ;;  %1042 = vmatprep.subr.bf16.mxu1 %v4100_v4  ;;  %v4113_v43 = vld [vmem:[%s5049_s3 + $0x60] ss:$16 sps:$4 sm:$0xff]  }
 0x2ad   :  { %v301_v47 = vpack.c.bf16 %v284_v46, %v284_v46  ;;  %v4119_v45 = vld [vmem:[%s5049_s3 + $0x80] ss:$16 sps:$4 sm:$0xff]   ;;  %v4127_v46 = vld [vmem:[%s5049_s3 + $0xa4] ss:$16 sps:$4 sm:$0xff]  }
 0x2ae   :  { %v4179_v4 = vld [vmem:[%s5049_s3 + $0x1c0] ss:$16 sps:$4 sm:$0xff]  }
 0x2af   :  { %415 = vmatmul.mubr.bf16.vlgmr.msra.gmra.mrb[8].mxu0 %v301_v47  ;;  %v4125_v47 = vld [vmem:[%s5049_s3 + $0xa0] ss:$16 sps:$4 sm:$0xff]  }
 0x2b0   :  { %600 = vmatprep.mubr.f32.mxu0 %v4248_v0  ;;  %3979 = vmatpush1.bf16.msra.mxu0 %v3978_v1  ;;  %v4173_v1 = vld [vmem:[%s5049_s3 + $0x1a0] ss:$16 sps:$4 sm:$0xff]  }
 0x2b1   :  { %1001 = vmatprep.subr.bf16.mxu0 %v4097_v2  ;;  %v4181_v2 = vld [vmem:[%s5049_s3 + $0x1c4] ss:$16 sps:$4 sm:$0xff]  }
 0x382   :  { %v4565_v53 = vpop.f32.mrb[8].mxu0 }
 0x383   :  { %v4567_v54 = vpop.f32.mrb[9].mxu0  ;;  %v423_v57 = vmul.f32 %v4565_v53, %v4565_v53 }
 0x384   :  { %v424_v55 = vmul.f32 %v4567_v54, %v4567_v54  ;;  %v420_v56 = vpop.f32.mrb[10].mxu0 }
 0x385   :  { %v421_v58 = vpop.f32.mrb[11].mxu0  ;;  %v4149_v56 = vld [vmem:[%s5049_s3 + $0x120] ss:$16 sps:$4 sm:$0xff]  }
 0x386   :  { %521 = vmatprep.mubr.f32.mxu1 %v424_v55  ;;  %v4151_v55 = vld [vmem:[%s5049_s3 + $0x124] ss:$16 sps:$4 sm:$0xff]   ;;  %v4155_v58 = vld [vmem:[%s5049_s3 + $0x140] ss:$16 sps:$4 sm:$0xff]  }
 0x387   :  { %522 = vmatmul.mubr.f32.vlgmr.msra.gmra.mrb[2].mxu1 %v423_v57  ;;  %v4157_v57 = vld [vmem:[%s5049_s3 + $0x144] ss:$16 sps:$4 sm:$0xff]  }
 0x388   :  { %1043 = vmatpush1.bf16.msra.mxu1 %v4098_v3  ;;  %v4184_v3 = vld [vmem:[%s5049_s3 + $0x1cc] ss:$16 sps:$4 sm:$0xff]  }
 0x389   :  { %1044 = vmatprep.subr.bf16.mxu1 %v4106_v5  ;;  %v4182_v5 = vld [vmem:[%s5049_s3 + $0x1c8] ss:$16 sps:$4 sm:$0xff]  }
 0x38c   :  { %1045 = vmatpush1.bf16.msra.mxu1 %v4104_v6  ;;  %v4187_v6 = vld [vmem:[%s5049_s3 + $0x1e4] ss:$16 sps:$4 sm:$0xff]  }
 0x38d   :  { %1046 = vmatprep.subr.bf16.mxu1 %v4112_v7  ;;  %v4190_v7 = vld [vmem:[%s5049_s3 + $0x1ec] ss:$16 sps:$4 sm:$0xff]  }
 0x390   :  { %1047 = vmatpush1.bf16.msra.mxu1 %v4110_v8  ;;  %v4185_v8 = vld [vmem:[%s5049_s3 + $0x1e0] ss:$16 sps:$4 sm:$0xff]  }
 0x391   :  { %1048 = vmatprep.subr.bf16.mxu1 %v4118_v9  ;;  %v4188_v9 = vld [vmem:[%s5049_s3 + $0x1e8] ss:$16 sps:$4 sm:$0xff]  }
 0x394   :  { %1049 = vmatpush1.bf16.msra.mxu1 %v4116_v10  ;;  %v1103_v10 = vld [vmem:[%s5053_s7 + $0x80] sm:$0xff] }
 0x395   :  { %1050 = vmatprep.subr.bf16.mxu1 %v4124_v11  ;;  %v1104_v11 = vld [vmem:[%s5053_s7 + $0x88] sm:$0xff] }
 0x398   :  { %1051 = vmatpush1.bf16.msra.mxu1 %v4122_v12  ;;  %v1135_v12 = vld [vmem:[%s5053_s7 + $0x180] sm:$0xff] }
 0x399   :  { %1052 = vmatprep.subr.bf16.mxu1 %v4130_v13  ;;  %v3980_v13 = vpack.c.bf16 %v1104_v11, %v1103_v10  ;;  %v1096_v10 = vld [vmem:[%s5053_s7 + $0x48] sm:$0xff] }
 0x39c   :  { %1053 = vmatpush1.bf16.msra.mxu1 %v4128_v14  ;;  %v1136_v14 = vld [vmem:[%s5053_s7 + $0x188] sm:$0xff] }
 0x39d   :  { %1054 = vmatprep.subr.bf16.mxu1 %v4136_v15  ;;  %v4012_v15 = vpack.c.bf16 %v1136_v14, %v1135_v12  ;;  %v1128_v14 = vld [vmem:[%s5053_s7 + $0x148] sm:$0xff] }
 0x3a0   :  { %1055 = vmatpush1.bf16.msra.mxu1 %v4134_v16 }
 0x3a1   :  { %1056 = vmatprep.subr.bf16.mxu1 %v4142_v17 }
 0x3a4   :  { %1057 = vmatpush1.bf16.msra.mxu1 %v4140_v18 }
 0x3a5   :  { %1058 = vmatprep.subr.bf16.mxu1 %v4148_v19 }
 0x3a8   :  { %1059 = vmatpush1.bf16.msra.mxu1 %v4146_v20 }
 0x3a9   :  { %1060 = vmatprep.subr.bf16.mxu1 %v4154_v21  ;;  %v1087_v21 = vld [vmem:[%s5053_s7] sm:$0xff] }
 0x3ac   :  { %1061 = vmatpush1.bf16.msra.mxu1 %v4152_v22  ;;  %v1088_v22 = vld [vmem:[%s5053_s7 + $0x8] sm:$0xff] }
 0x3ad   :  { %1062 = vmatprep.subr.bf16.mxu1 %v4160_v23 }
 0x3b0   :  { %1063 = vmatpush1.bf16.msra.mxu1 %v4158_v24  ;;  %v1119_v24 = vld [vmem:[%s5053_s7 + $0x100] sm:$0xff] }
 0x3b1   :  { %1064 = vmatprep.subr.bf16.mxu1 %v4166_v25 }
 0x3b4   :  { %1065 = vmatpush1.bf16.msra.mxu1 %v4164_v26  ;;  %v1106_v26 = vld [vmem:[%s5053_s7 + $0x98] sm:$0xff] }
 0x3b5   :  { %1066 = vmatprep.subr.bf16.mxu1 %v4172_v27  ;;  %v1137_v27 = vld [vmem:[%s5053_s7 + $0x190] sm:$0xff] }
 0x3b8   :  { %1067 = vmatpush1.bf16.msra.mxu1 %v4170_v28  ;;  %v1138_v28 = vld [vmem:[%s5053_s7 + $0x198] sm:$0xff] }
 0x3b9   :  { %1068 = vmatprep.subr.bf16.mxu1 %v4178_v29 }
 0x3bc   :  { %1069 = vmatpush1.bf16.msra.mxu1 %v4176_v31 }
 0x3bd   :  { %1070 = vmatprep.subr.bf16.mxu1 %v4184_v3  ;;  %v1111_v3 = vld [vmem:[%s5053_s7 + $0xc0] sm:$0xff] }
 0x3c0   :  { %1071 = vmatpush1.bf16.msra.mxu1 %v4182_v5  ;;  %v1143_v5 = vld [vmem:[%s5053_s7 + $0x1c0] sm:$0xff] }
 0x3c1   :  { %1072 = vmatprep.subr.bf16.mxu1 %v4190_v7 }
 0x3c4   :  { %1073 = vmatpush1.bf16.msra.mxu1 %v4188_v9  ;;  %v1095_v9 = vld [vmem:[%s5053_s7 + $0x40] sm:$0xff] }
 0x3c5   :  { %4013 = vmatprep.subr.bf16.mxu1 %v4012_v15  ;;  %v1113_v15 = vld [vmem:[%s5053_s7 + $0xd0] sm:$0xff] }
 0x45a   :  { %v3787_v32 = vpop.f32.mrb[2].mxu1 }
 0x45b   :  { %v3788_v33 = vpop.f32.mrb[3].mxu1 }
 0x45c   :  { %v3789_v34 = vadd.f32 %v3788_v33, %v3787_v32  ;;  %v3982_v32 = vpack.c.bf16 %v1088_v22, %v1087_v21  ;;  %v1097_v21 = vld [vmem:[%s5053_s7 + $0x50] sm:$0xff]  ;;  %v1098_v22 = vld [vmem:[%s5053_s7 + $0x58] sm:$0xff] }
 0x45e   :  { %v524_v35 = vadd.f32 1e-05, %v3789_v34  ;;  %v1089_v34 = vld [vmem:[%s5053_s7 + $0x10] sm:$0xff] }
 0x460   :  { %4193 = vrsqrt.f32 %v524_v35  ;;  %v1090_v35 = vld [vmem:[%s5053_s7 + $0x18] sm:$0xff] }
 0x46a   :  { %v4194_v38 = vpop.eup %4193 }
 0x46b   :  { %3407 = vmatmul.mubr.msk.f32.vlgmr.msra.gmra.mrb[6].mxu0 %vm532_vm3, %v4194_v38  ;;  %v4016_v38 = vpack.c.bf16 %v1138_v28, %v1137_v27  ;;  %v1147_v27 = vld [vmem:[%s5053_s7 + $0x1e0] sm:$0xff]  ;;  %v1148_v28 = vld [vmem:[%s5053_s7 + $0x1e8] sm:$0xff] }
 0x46c   :  { %1002 = vmatpush1.bf16.msra.mxu0 %v4095_v36 }
 0x46d   :  { %1003 = vmatprep.subr.bf16.mxu0 %v4103_v37 }
 0x470   :  { %1004 = vmatpush1.bf16.msra.mxu0 %v4101_v39  ;;  %v1121_v39 = vld [vmem:[%s5053_s7 + $0x110] sm:$0xff] }
 0x471   :  { %1005 = vmatprep.subr.bf16.mxu0 %v4109_v40  ;;  %v1122_v40 = vld [vmem:[%s5053_s7 + $0x118] sm:$0xff] }
 0x474   :  { %1006 = vmatpush1.bf16.msra.mxu0 %v4107_v41  ;;  %v1107_v41 = vld [vmem:[%s5053_s7 + $0xa0] sm:$0xff] }
 0x475   :  { %1007 = vmatprep.subr.bf16.mxu0 %v4115_v42  ;;  %v1108_v42 = vld [vmem:[%s5053_s7 + $0xa8] sm:$0xff] }
 0x478   :  { %1008 = vmatpush1.bf16.msra.mxu0 %v4113_v43  ;;  %v1139_v43 = vld [vmem:[%s5053_s7 + $0x1a0] sm:$0xff] }
 0x479   :  { %1009 = vmatprep.subr.bf16.mxu0 %v4121_v44  ;;  %v1140_v44 = vld [vmem:[%s5053_s7 + $0x1a8] sm:$0xff] }
 0x47c   :  { %1010 = vmatpush1.bf16.msra.mxu0 %v4119_v45  ;;  %v3986_v45 = vpack.c.bf16 %v1090_v35, %v1089_v34  ;;  %v4036_v34 = vpack.c.bf16 %v1148_v28, %v1147_v27  ;;  %v1100_v35 = vld [vmem:[%s5053_s7 + $0x68] sm:$0xff] }
 0x47d   :  { %1011 = vmatprep.subr.bf16.mxu0 %v4127_v46  ;;  %v4018_v46 = vpack.c.bf16 %v1122_v40, %v1121_v39  ;;  %v1117_v40 = vld [vmem:[%s5053_s7 + $0xf0] sm:$0xff]  ;;  %v1507_v27 = vld [vmem:[#allocation2 + $0x188] sm:$0xff] }
 0x47e   :  { %v1511_v28 = vld [vmem:[#allocation2 + $0x1a8] sm:$0xff] }
 0x480   :  { %1012 = vmatpush1.bf16.msra.mxu0 %v4125_v47  ;;  %v1091_v47 = vld [vmem:[%s5053_s7 + $0x20] sm:$0xff] }
 0x481   :  { %1013 = vmatprep.subr.bf16.mxu0 %v4133_v48  ;;  %v1092_v48 = vld [vmem:[%s5053_s7 + $0x28] sm:$0xff] }
 0x484   :  { %1014 = vmatpush1.bf16.msra.mxu0 %v4131_v49  ;;  %v3988_v49 = vpack.c.bf16 %v1108_v42, %v1107_v41  ;;  %v1118_v41 = vld [vmem:[%s5053_s7 + $0xf8] sm:$0xff]  ;;  %v1149_v42 = vld [vmem:[%s5053_s7 + $0x1f0] sm:$0xff] }
 0x485   :  { %1015 = vmatprep.subr.bf16.mxu0 %v4139_v50  ;;  %v4020_v50 = vpack.c.bf16 %v1140_v44, %v1139_v43  ;;  %v4008_v43 = vpack.c.bf16 %v1118_v41, %v1117_v40  ;;  %v1150_v44 = vld [vmem:[%s5053_s7 + $0x1f8] sm:$0xff]  ;;  %v1531_v40 = vld [vmem:[#allocation2 + $0x248] sm:$0xff] }
 0x486   :  { %v1535_v41 = vld [vmem:[#allocation2 + $0x268] sm:$0xff] }
 0x488   :  { %1016 = vmatpush1.bf16.msra.mxu0 %v4137_v30  ;;  %v1123_v30 = vld [vmem:[%s5053_s7 + $0x120] sm:$0xff] }
 0x489   :  { %1017 = vmatprep.subr.bf16.mxu0 %v4145_v51  ;;  %v1124_v51 = vld [vmem:[%s5053_s7 + $0x128] sm:$0xff] }
 0x48c   :  { %1018 = vmatpush1.bf16.msra.mxu0 %v4143_v52  ;;  %v1109_v52 = vld [vmem:[%s5053_s7 + $0xb0] sm:$0xff] }
 0x48d   :  { %1019 = vmatprep.subr.bf16.mxu0 %v4151_v55  ;;  %v1110_v55 = vld [vmem:[%s5053_s7 + $0xb8] sm:$0xff] }
 0x490   :  { %1020 = vmatpush1.bf16.msra.mxu0 %v4149_v56  ;;  %v1141_v56 = vld [vmem:[%s5053_s7 + $0x1b0] sm:$0xff] }
 0x491   :  { %1021 = vmatprep.subr.bf16.mxu0 %v4157_v57  ;;  %v1142_v57 = vld [vmem:[%s5053_s7 + $0x1b8] sm:$0xff] }
 0x494   :  { %1022 = vmatpush1.bf16.msra.mxu0 %v4155_v58  ;;  %v3990_v58 = vpack.c.bf16 %v1092_v48, %v1091_v47  ;;  %v4040_v47 = vpack.c.bf16 %v1150_v44, %v1149_v42  ;;  %v3549_v42 = vcombine.high %v1531_v40, %v1535_v41  ;;  %v1539_v44 = vld [vmem:[#allocation2 + $0x288] sm:$0xff] }
 0x495   :  { %1023 = vmatprep.subr.bf16.mxu0 %v4163_v59  ;;  %v4022_v59 = vpack.c.bf16 %v1124_v51, %v1123_v30 }
 0x498   :  { %1024 = vmatpush1.bf16.msra.mxu0 %v4161_v60  ;;  %v1093_v60 = vld [vmem:[%s5053_s7 + $0x30] sm:$0xff] }
 0x499   :  { %1025 = vmatprep.subr.bf16.mxu0 %v4169_v61  ;;  %v1094_v61 = vld [vmem:[%s5053_s7 + $0x38] sm:$0xff] }
 0x49a   :  { %v3994_v7 = vpack.c.bf16 %v1094_v61, %v1093_v60 }
 0x49c   :  { %1026 = vmatpush1.bf16.msra.mxu0 %v4167_v62  ;;  %v3992_v62 = vpack.c.bf16 %v1110_v55, %v1109_v52 }
 0x49d   :  { %1027 = vmatprep.subr.bf16.mxu0 %v4175_v63  ;;  %v4024_v63 = vpack.c.bf16 %v1142_v57, %v1141_v56 }
 0x4a0   :  { %1028 = vmatpush1.bf16.msra.mxu0 %v4173_v1  ;;  %v1125_v1 = vld [vmem:[%s5053_s7 + $0x130] sm:$0xff] }
 0x4a1   :  { %1029 = vmatprep.subr.bf16.mxu0 %v4181_v2  ;;  %v1126_v2 = vld [vmem:[%s5053_s7 + $0x138] sm:$0xff] }
 0x4a4   :  { %1030 = vmatpush1.bf16.msra.mxu0 %v4179_v4  ;;  %v1112_v4 = vld [vmem:[%s5053_s7 + $0xc8] sm:$0xff] }
 0x4a5   :  { %1031 = vmatprep.subr.bf16.mxu0 %v4187_v6  ;;  %v1144_v6 = vld [vmem:[%s5053_s7 + $0x1c8] sm:$0xff]  ;;  %v3996_v11 = vpack.c.bf16 %v1112_v4, %v1111_v3  ;;  %v1292_v3 = vld [vmem:[%s5056_s10] sm:$0xff]  ;;  %v1295_v4 = vld [vmem:[%s5056_s10 + $0x18] sm:$0xff] }
 0x4a6   :  { %v4028_v12 = vpack.c.bf16 %v1144_v6, %v1143_v5  ;;  %v1459_v5 = vld [vmem:[#allocation2 + $0x8] sm:$0xff] }
 0x4a7   :  { %v1463_v6 = vld [vmem:[#allocation2 + $0x28] sm:$0xff] }
 0x4a8   :  { %1032 = vmatpush1.bf16.msra.mxu0 %v4185_v8  ;;  %v4026_v8 = vpack.c.bf16 %v1126_v2, %v1125_v1  ;;  %v1293_v2 = vld [vmem:[%s5056_s10 + $0x8] sm:$0xff] }
 0x4a9   :  { %3981 = vmatprep.subr.bf16.mxu0 %v3980_v13  ;;  %v1127_v13 = vld [vmem:[%s5053_s7 + $0x140] sm:$0xff] }
 0x53e   :  { %v602_v16 = vpop.f32.mrb[6].mxu0 }
 0x53f   :  { %v607_v17 = vmul.f32 %v602_v16, %v4565_v53  ;;  %v604_v18 = vpop.f32.mrb[7].mxu0  ;;  %v1120_v53 = vld [vmem:[%s5053_s7 + $0x108] sm:$0xff]  ;;  %v1114_v16 = vld [vmem:[%s5053_s7 + $0xd8] sm:$0xff] }
 0x540   :  { %v608_v19 = vmul.f32 %v604_v18, %v4567_v54  ;;  %v1105_v54 = vld [vmem:[%s5053_s7 + $0x90] sm:$0xff]  ;;  %v4014_v33 = vpack.c.bf16 %v1120_v53, %v1119_v24  ;;  %v1146_v18 = vld [vmem:[%s5053_s7 + $0x1d8] sm:$0xff] }
 0x541   :  { %vm609_vm4 = vcmp.ge.f32.partialorder %v607_v17, 0.0  ;;  %v611_v20 = vmul.f32 0.01, %v607_v17  ;;  %v3984_v37 = vpack.c.bf16 %v1106_v26, %v1105_v54  ;;  %v1129_v53 = vld [vmem:[%s5053_s7 + $0x150] sm:$0xff]  ;;  %v1130_v54 = vld [vmem:[%s5053_s7 + $0x158] sm:$0xff]  ;;  %v1116_v26 = vld [vmem:[%s5053_s7 + $0xe8] sm:$0xff] }
 0x542   :  { %vm610_vm5 = vcmp.ge.f32.partialorder %v608_v19, 0.0  ;;  %v612_v23 = vmul.f32 0.01, %v608_v19 }
 0x543   :  { %v613_v25 = vsel %vm609_vm4, %v607_v17, %v611_v20  ;;  %v1145_v17 = vld [vmem:[%s5053_s7 + $0x1d0] sm:$0xff]  ;;  %v4030_v20 = vpack.c.bf16 %v1128_v14, %v1127_v13  ;;  %v1475_v13 = vld [vmem:[#allocation2 + $0x88] sm:$0xff] }
 0x544   :  { %v614_v29 = vsel %vm610_vm5, %v608_v19, %v612_v23  ;;  %v679_v36 = vpack.c.bf16 %v613_v25, %v613_v25  ;;  %v3998_v19 = vpack.c.bf16 %v1096_v10, %v1095_v9  ;;  %v4000_v23 = vpack.c.bf16 %v1114_v16, %v1113_v15  ;;  %v1115_v25 = vld [vmem:[%s5053_s7 + $0xe0] sm:$0xff]  ;;  %v1467_v9 = vld [vmem:[#allocation2 + $0x48] sm:$0xff] }
 0x545   :  { %v680_v31 = vpack.c.bf16 %v614_v29, %v614_v29  ;;  %v4032_v24 = vpack.c.bf16 %v1146_v18, %v1145_v17  ;;  %v4002_v29 = vpack.c.bf16 %v1098_v22, %v1097_v21  ;;  %v1471_v10 = vld [vmem:[#allocation2 + $0x68] sm:$0xff] }
 0x546   :  { %v1479_v14 = vld [vmem:[#allocation2 + $0xa8] sm:$0xff] }
 0x547   :  { %1033 = vmatprep.mubr.bf16.mxu0 %v680_v31  ;;  %1074 = vmatprep.mubr.bf16.mxu1 %v680_v31  ;;  %v4034_v31 = vpack.c.bf16 %v1130_v54, %v1129_v53  ;;  %v3493_v15 = vcombine.high %v1475_v13, %v1479_v14  ;;  %v3492_v16 = vcombine.low %v1475_v13, %v1479_v14  ;;  %v1483_v17 = vld [vmem:[#allocation2 + $0xc8] sm:$0xff] }
 0x548   :  { %1034 = vmatmul.mubr.bf16.vlgmr.msra.gmra.mrb[12].mxu0 %v679_v36  ;;  %1075 = vmatmul.mubr.bf16.vlgmr.msra.gmra.mrb[4].mxu1 %v679_v36  ;;  %v1131_v36 = vld [vmem:[%s5053_s7 + $0x160] sm:$0xff]  ;;  %v1487_v18 = vld [vmem:[#allocation2 + $0xe8] sm:$0xff] }
 0x549   :  { %3983 = vmatpush3.bf16.msra.mxu0 %v3982_v32  ;;  %4015 = vmatpush3.bf16.msra.mxu1 %v4014_v33  ;;  %v1099_v32 = vld [vmem:[%s5053_s7 + $0x60] sm:$0xff]  ;;  %v4004_v33 = vpack.c.bf16 %v1116_v26, %v1115_v25  ;;  %v1491_v21 = vld [vmem:[#allocation2 + $0x108] sm:$0xff] }
 0x54a   :  { %3985 = vmatprep.subr.bf16.mxu0 %v3984_v37  ;;  %4017 = vmatprep.subr.bf16.mxu1 %v4016_v38  ;;  %v1132_v37 = vld [vmem:[%s5053_s7 + $0x168] sm:$0xff]  ;;  %v4006_v38 = vpack.c.bf16 %v1100_v35, %v1099_v32 }
 0x54b   :  { %v4038_v39 = vpack.c.bf16 %v1132_v37, %v1131_v36  ;;  %v1495_v22 = vld [vmem:[#allocation2 + $0x128] sm:$0xff] }
 0x54c   :  { %v1499_v53 = vld [vmem:[#allocation2 + $0x148] sm:$0xff] }
 0x54d   :  { %3987 = vmatpush3.bf16.msra.mxu0 %v3986_v45  ;;  %4019 = vmatpush3.bf16.msra.mxu1 %v4018_v46  ;;  %v1101_v45 = vld [vmem:[%s5053_s7 + $0x70] sm:$0xff]  ;;  %v1102_v46 = vld [vmem:[%s5053_s7 + $0x78] sm:$0xff]  ;;  %v1503_v54 = vld [vmem:[#allocation2 + $0x168] sm:$0xff] }
 0x54e   :  { %3989 = vmatprep.subr.bf16.mxu0 %v3988_v49  ;;  %4021 = vmatprep.subr.bf16.mxu1 %v4020_v50  ;;  %v4010_v48 = vpack.c.bf16 %v1102_v46, %v1101_v45  ;;  %v1133_v49 = vld [vmem:[%s5053_s7 + $0x170] sm:$0xff]  ;;  %v1134_v50 = vld [vmem:[%s5053_s7 + $0x178] sm:$0xff]  ;;  %v3517_v25 = vcombine.high %v1499_v53, %v1503_v54  ;;  %v3516_v26 = vcombine.low %v1499_v53, %v1503_v54  ;;  %v1515_v32 = vld [vmem:[#allocation2 + $0x1c8] sm:$0xff] }
 0x54f   :  { %v4042_v30 = vpack.c.bf16 %v1134_v50, %v1133_v49  ;;  %v1523_v36 = vld [vmem:[#allocation2 + $0x208] sm:$0xff] }
 0x550   :  { %v1527_v37 = vld [vmem:[#allocation2 + $0x228] sm:$0xff] }
 0x551   :  { %3991 = vmatpush3.bf16.msra.mxu0 %v3990_v58  ;;  %4023 = vmatpush3.bf16.msra.mxu1 %v4022_v59  ;;  %v1543_v45 = vld [vmem:[#allocation2 + $0x2a8] sm:$0xff] }
 0x552   :  { %3993 = vmatprep.subr.bf16.mxu0 %v3992_v62  ;;  %4025 = vmatprep.subr.bf16.mxu1 %v4024_v63  ;;  %v3557_v46 = vcombine.high %v1539_v44, %v1543_v45  ;;  %v1551_v49 = vld [vmem:[#allocation2 + $0x2e8] sm:$0xff] }
 0x555   :  { %3995 = vmatpush3.bf16.msra.mxu0 %v3994_v7  ;;  %4027 = vmatpush3.bf16.msra.mxu1 %v4026_v8  ;;  %v3476_v7 = vcombine.low %v1459_v5, %v1463_v6  ;;  %v3477_v8 = vcombine.high %v1459_v5, %v1463_v6 }
 0x556   :  { %3997 = vmatprep.subr.bf16.mxu0 %v3996_v11  ;;  %4029 = vmatprep.subr.bf16.mxu1 %v4028_v12  ;;  %v3485_v11 = vcombine.high %v1467_v9, %v1471_v10  ;;  %v3484_v12 = vcombine.low %v1467_v9, %v1471_v10  ;;  %v1458_v10 = vld [vmem:[#allocation2] sm:$0xff] }
 0x559   :  { %3999 = vmatpush3.bf16.msra.mxu0 %v3998_v19  ;;  %4031 = vmatpush3.bf16.msra.mxu1 %v4030_v20  ;;  %v3501_v19 = vcombine.high %v1483_v17, %v1487_v18  ;;  %v3500_v20 = vcombine.low %v1483_v17, %v1487_v18 }
 0x55a   :  { %4001 = vmatprep.subr.bf16.mxu0 %v4000_v23  ;;  %4033 = vmatprep.subr.bf16.mxu1 %v4032_v24  ;;  %v3509_v23 = vcombine.high %v1491_v21, %v1495_v22  ;;  %v3508_v24 = vcombine.low %v1491_v21, %v1495_v22 }
 0x55d   :  { %4003 = vmatpush3.bf16.msra.mxu0 %v4002_v29  ;;  %4035 = vmatpush3.bf16.msra.mxu1 %v4034_v31  ;;  %v3525_v29 = vcombine.high %v1507_v27, %v1511_v28  ;;  %v3524_v31 = vcombine.low %v1507_v27, %v1511_v28  ;;  %v1498_v28 = vld [vmem:[#allocation2 + $0x140] sm:$0xff] }
 0x55e   :  { %4005 = vmatprep.subr.bf16.mxu0 %v4004_v33  ;;  %4037 = vmatprep.subr.bf16.mxu1 %v4036_v34  ;;  %v1519_v33 = vld [vmem:[#allocation2 + $0x1e8] sm:$0xff] }
 0x55f   :  { %v3533_v34 = vcombine.high %v1515_v32, %v1519_v33  ;;  %v3532_v35 = vcombine.low %v1515_v32, %v1519_v33  ;;  %v1506_v33 = vld [vmem:[#allocation2 + $0x180] sm:$0xff] }
 0x561   :  { %4007 = vmatpush3.bf16.msra.mxu0 %v4006_v38  ;;  %4039 = vmatpush3.bf16.msra.mxu1 %v4038_v39  ;;  %v3541_v38 = vcombine.high %v1523_v36, %v1527_v37  ;;  %v3540_v39 = vcombine.low %v1523_v36, %v1527_v37  ;;  %v1514_v37 = vld [vmem:[#allocation2 + $0x1c0] sm:$0xff] }
 0x562   :  { %4009 = vmatprep.subr.bf16.mxu0 %v4008_v43  ;;  %4041 = vmatprep.subr.bf16.mxu1 %v4040_v47  ;;  %v3548_v43 = vcombine.low %v1531_v40, %v1535_v41  ;;  %v3556_v47 = vcombine.low %v1539_v44, %v1543_v45  ;;  %v1522_v41 = vld [vmem:[#allocation2 + $0x200] sm:$0xff] }
 0x563   :  { %v1530_v45 = vld [vmem:[#allocation2 + $0x240] sm:$0xff] }
 0x565   :  { %4011 = vmatpush3.bf16.msra.mxu0 %v4010_v48  ;;  %4043 = vmatpush3.bf16.msra.mxu1 %v4042_v30  ;;  %v1547_v48 = vld [vmem:[#allocation2 + $0x2c8] sm:$0xff] }
 0x566   :  { %1300 = vmatprep.subr.mxu0 %v1293_v2  ;;  %3080 = vmatprep.subr.bf16.mxu1 %v3477_v8  ;;  %v3565_v50 = vcombine.high %v1547_v48, %v1551_v49  ;;  %v3564_v30 = vcombine.low %v1547_v48, %v1551_v49  ;;  %v1538_v49 = vld [vmem:[#allocation2 + $0x280] sm:$0xff] }
 0x61b   :  { %v4971_v51 = vpop.f32.mrb[12].mxu0  ;;  %v4973_v52 = vpop.f32.mrb[4].mxu1 }
 0x61c   :  { %v4975_v55 = vpop.f32.mrb[13].mxu0  ;;  %v4977_v56 = vpop.f32.mrb[5].mxu1  ;;  %v1083_v61 = vmul.f32 %v4971_v51, %v4971_v51  ;;  %v1085_v62 = vmul.f32 %v4973_v52, %v4973_v52 }
 0x61d   :  { %v1084_v57 = vmul.f32 %v4975_v55, %v4975_v55  ;;  %v1086_v58 = vmul.f32 %v4977_v56, %v4977_v56  ;;  %v1039_v59 = vpop.f32.mrb[14].mxu0  ;;  %v1080_v60 = vpop.f32.mrb[6].mxu1 }
 0x61e   :  { %v1040_v63 = vpop.f32.mrb[15].mxu0  ;;  %v1081_v1 = vpop.f32.mrb[7].mxu1 }
 0x61f   :  { %1215 = vmatprep.mubr.f32.mxu0 %v1084_v57  ;;  %1285 = vmatprep.mubr.f32.mxu1 %v1086_v58  ;;  %v1555_v57 = vld [vmem:[#allocation2 + $0x308] sm:$0xff] }
 0x620   :  { %1216 = vmatmul.mubr.f32.vlgmr.msra.gmra.mrb[16].mxu0 %v1083_v61  ;;  %1286 = vmatmul.mubr.f32.vlgmr.msra.gmra.mrb[8].mxu1 %v1085_v62  ;;  %v1559_v58 = vld [vmem:[#allocation2 + $0x328] sm:$0xff] }
 0x621   :  { %1364 = vmatprep.mubr.f32.mxu0 %v4248_v0  ;;  %1301 = vmatpush1.msra.mxu0 %v1292_v3  ;;  %v3573_v59 = vcombine.high %v1555_v57, %v1559_v58  ;;  %v3572_v60 = vcombine.low %v1555_v57, %v1559_v58  ;;  %v1563_v61 = vld [vmem:[#allocation2 + $0x348] sm:$0xff]  ;;  %v1546_v58 = vld [vmem:[#allocation2 + $0x2c0] sm:$0xff] }
 0x622   :  { %1371 = vmatprep.subr.mxu0 %v1295_v4  ;;  %3081 = vmatpush1.bf16.msra.mxu1 %v3476_v7  ;;  %v1567_v62 = vld [vmem:[#allocation2 + $0x368] sm:$0xff] }
 0x623   :  { %3082 = vmatprep.subr.bf16.mxu1 %v3485_v11  ;;  %v3581_v63 = vcombine.high %v1563_v61, %v1567_v62  ;;  %v3580_v1 = vcombine.low %v1563_v61, %v1567_v62  ;;  %v1462_v11 = vld [vmem:[#allocation2 + $0x20] sm:$0xff] }
 0x624   :  { %v3475_v13 = vcombine.high %v1458_v10, %v1462_v11  ;;  %v3474_v17 = vcombine.low %v1458_v10, %v1462_v11  ;;  %v1554_v62 = vld [vmem:[#allocation2 + $0x300] sm:$0xff]  ;;  %v1571_v10 = vld [vmem:[#allocation2 + $0x388] sm:$0xff] }
 0x626   :  { %3083 = vmatpush1.bf16.msra.mxu1 %v3484_v12  ;;  %v1294_v12 = vld [vmem:[%s5056_s10 + $0x10] sm:$0xff]  ;;  %s4253_s10 = smov [#allocation5]  }
 0x627   :  { %3084 = vmatprep.subr.bf16.mxu1 %v3493_v15  ;;  %v1466_v15 = vld [vmem:[#allocation2 + $0x40] sm:$0xff]  ;;  %s3378_s26 = sshll.u32 %s4253_s10, 4  ;;  %s3379_s26 = int_to_ptr.vmem [resolvable:$true] %s3378_s26 }
 0x628   :  { %s4219_s27 = scalar_lea.vmem %s3379_s26, 256  ;;  %p4224_p9 = scmp.lt.s32.totalorder %s3379_s26, %s3379_s26 }
 0x629   :  { %p4220_p8 = scmp.ne.s32.totalorder %s3379_s26, %s4219_s27  ;;  %p4225_p10 = scmp.lt.s32.totalorder %s4219_s27, %s4219_s27 }
 0x62a   :  { %3085 = vmatpush1.bf16.msra.mxu1 %v3492_v16  ;;  %v1470_v16 = vld [vmem:[#allocation2 + $0x60] sm:$0xff] }
 0x62b   :  { %3086 = vmatprep.subr.bf16.mxu1 %v3501_v19  ;;  %v3483_v18 = vcombine.high %v1466_v15, %v1470_v16  ;;  %v1474_v19 = vld [vmem:[#allocation2 + $0x80] sm:$0xff]  ;;  %v3482_v21 = vcombine.low %v1466_v15, %v1470_v16  ;;  %p4226_p11 = por %p4225_p10, %p4224_p9 }
 0x62c   :  { %v1578_v16 = vld [vmem:[#allocation2 + $0x3c0] sm:$0xff] }
 0x62d   :  { %p4227_p12 = pnand %p4226_p11, %p4220_p8 }
 0x62e   :  { %3087 = vmatpush1.bf16.msra.mxu1 %v3500_v20  ;;  %v1478_v20 = vld [vmem:[#allocation2 + $0xa0] sm:$0xff] }
 0x62f   :  { %3088 = vmatprep.subr.bf16.mxu1 %v3509_v23  ;;  %v3491_v22 = vcombine.high %v1474_v19, %v1478_v20  ;;  %v1482_v23 = vld [vmem:[#allocation2 + $0xc0] sm:$0xff]  ;;  %v3490_v53 = vcombine.low %v1474_v19, %v1478_v20  ;;  %v1583_v20 = vld [vmem:[#allocation2 + $0x3e8] sm:$0xff] }
 0x632   :  { %3089 = vmatpush1.bf16.msra.mxu1 %v3508_v24  ;;  %v1486_v24 = vld [vmem:[#allocation2 + $0xe0] sm:$0xff] }
 0x633   :  { %3090 = vmatprep.subr.bf16.mxu1 %v3517_v25  ;;  %v3499_v54 = vcombine.high %v1482_v23, %v1486_v24  ;;  %v1490_v25 = vld [vmem:[#allocation2 + $0x100] sm:$0xff] }
 0x636   :  { %3091 = vmatpush1.bf16.msra.mxu1 %v3516_v26  ;;  %v1494_v26 = vld [vmem:[#allocation2 + $0x120] sm:$0xff] }
 0x637   :  { %3092 = vmatprep.subr.bf16.mxu1 %v3525_v29  ;;  %v3507_v27 = vcombine.high %v1490_v25, %v1494_v26  ;;  %v1502_v29 = vld [vmem:[#allocation2 + $0x160] sm:$0xff] }
 0x638   :  { %v3515_v32 = vcombine.high %v1498_v28, %v1502_v29 }
 0x63a   :  { %3093 = vmatpush1.bf16.msra.mxu1 %v3524_v31  ;;  %v3506_v31 = vcombine.low %v1490_v25, %v1494_v26  ;;  %v1591_v26 = vld [vmem:[#allocation2 + $0x428] sm:$0xff] }
 0x63b   :  { %3094 = vmatprep.subr.bf16.mxu1 %v3533_v34  ;;  %v1510_v34 = vld [vmem:[#allocation2 + $0x1a0] sm:$0xff] }
 0x63c   :  { %v3523_v36 = vcombine.high %v1506_v33, %v1510_v34 }
 0x63e   :  { %3095 = vmatpush1.bf16.msra.mxu1 %v3532_v35  ;;  %v3514_v35 = vcombine.low %v1498_v28, %v1502_v29 }
 0x63f   :  { %3096 = vmatprep.subr.bf16.mxu1 %v3541_v38  ;;  %v1518_v38 = vld [vmem:[#allocation2 + $0x1e0] sm:$0xff] }
 0x640   :  { %v3531_v40 = vcombine.high %v1514_v37, %v1518_v38 }
 0x642   :  { %3097 = vmatpush1.bf16.msra.mxu1 %v3540_v39  ;;  %v3522_v39 = vcombine.low %v1506_v33, %v1510_v34 }
 0x643   :  { %3098 = vmatprep.subr.bf16.mxu1 %v3549_v42  ;;  %v1526_v42 = vld [vmem:[#allocation2 + $0x220] sm:$0xff] }
 0x644   :  { %v3539_v44 = vcombine.high %v1522_v41, %v1526_v42 }
 0x646   :  { %3099 = vmatpush1.bf16.msra.mxu1 %v3548_v43  ;;  %v3530_v43 = vcombine.low %v1514_v37, %v1518_v38  ;;  %v1594_v37 = vld [vmem:[#allocation2 + $0x440] sm:$0xff] }
 0x647   :  { %3100 = vmatprep.subr.bf16.mxu1 %v3557_v46  ;;  %v1534_v46 = vld [vmem:[#allocation2 + $0x260] sm:$0xff] }
 0x648   :  { %v3547_v48 = vcombine.high %v1530_v45, %v1534_v46  ;;  %v1598_v38 = vld [vmem:[#allocation2 + $0x460] sm:$0xff] }
 0x64a   :  { %3101 = vmatpush1.bf16.msra.mxu1 %v3556_v47  ;;  %v3538_v47 = vcombine.low %v1522_v41, %v1526_v42  ;;  %v1595_v42 = vld [vmem:[#allocation2 + $0x448] sm:$0xff] }
 0x64b   :  { %3102 = vmatprep.subr.bf16.mxu1 %v3565_v50  ;;  %v1542_v50 = vld [vmem:[#allocation2 + $0x2a0] sm:$0xff] }
 0x64c   :  { %v3555_v57 = vcombine.high %v1538_v49, %v1542_v50 }
 0x64e   :  { %3103 = vmatpush1.bf16.msra.mxu1 %v3564_v30  ;;  %v3546_v30 = vcombine.low %v1530_v45, %v1534_v46 }
 0x64f   :  { %3104 = vmatprep.subr.bf16.mxu1 %v3573_v59  ;;  %v1550_v59 = vld [vmem:[#allocation2 + $0x2e0] sm:$0xff] }
 0x650   :  { %v3563_v61 = vcombine.high %v1546_v58, %v1550_v59 }
 0x652   :  { %3105 = vmatpush1.bf16.msra.mxu1 %v3572_v60  ;;  %v3554_v60 = vcombine.low %v1538_v49, %v1542_v50  ;;  %v1602_v49 = vld [vmem:[#allocation2 + $0x480] sm:$0xff]  ;;  %v1603_v50 = vld [vmem:[#allocation2 + $0x488] sm:$0xff] }
 0x653   :  { %3106 = vmatprep.subr.bf16.mxu1 %v3581_v63  ;;  %v1558_v63 = vld [vmem:[#allocation2 + $0x320] sm:$0xff] }
 0x656   :  { %3107 = vmatpush1.bf16.msra.mxu1 %v3580_v1  ;;  %v3562_v1 = vcombine.low %v1546_v58, %v1550_v59  ;;  %v3610_v58 = vcombine.low %v1594_v37, %v1598_v38 }
 0x6f3   :  { %v3822_v2 = vpop.f32.mrb[16].mxu0  ;;  %v3857_v3 = vpop.f32.mrb[8].mxu1 }
 0x6f4   :  { %v3823_v4 = vpop.f32.mrb[17].mxu0  ;;  %v3858_v5 = vpop.f32.mrb[9].mxu1 }
 0x6f5   :  { %v3824_v6 = vadd.f32 %v3823_v4, %v3822_v2  ;;  %v3859_v7 = vadd.f32 %v3858_v5, %v3857_v3  ;;  %v3571_v2 = vcombine.high %v1554_v62, %v1558_v63  ;;  %v1562_v3 = vld [vmem:[#allocation2 + $0x340] sm:$0xff]  ;;  %v3570_v5 = vcombine.low %v1554_v62, %v1558_v63 }
 0x6f6   :  { %v1566_v4 = vld [vmem:[#allocation2 + $0x360] sm:$0xff] }
 0x6f7   :  { %v1218_v8 = vadd.f32 1e-05, %v3824_v6  ;;  %v3579_v6 = vcombine.high %v1562_v3, %v1566_v4  ;;  %v1610_v62 = vld [vmem:[#allocation2 + $0x4c0] sm:$0xff] }
 0x6f8   :  { %v1614_v63 = vld [vmem:[#allocation2 + $0x4e0] sm:$0xff] }
 0x6f9   :  { %v1288_v9 = vadd.f32 %v3859_v7, %v1218_v8  ;;  %v3578_v7 = vcombine.low %v1562_v3, %v1566_v4  ;;  %v1570_v8 = vld [vmem:[#allocation2 + $0x380] sm:$0xff] }
 0x6fb   :  { %4195 = vrsqrt.f32 %v1288_v9  ;;  %v1574_v9 = vld [vmem:[#allocation2 + $0x3a0] sm:$0xff] }
 0x6fc   :  { %v3587_v11 = vcombine.high %v1570_v8, %v1574_v9 }
 0x705   :  { %v4196_v14 = vpop.eup %4195 }
 0x706   :  { %3472 = vmatmul.mubr.msk.f32.vlgmr.msra.gmra.mrb[18].mxu0 %vm1296_vm6, %v4196_v14 }
 0x707   :  { %1372 = vmatpush1.msra.mxu0 %v1294_v12  ;;  %1435 = vmatprep.mubr.f32.mxu0 %v4248_v0  ;;  %v3498_v0 = vcombine.low %v1482_v23, %v1486_v24  ;;  %v1575_v12 = vld [vmem:[#allocation2 + $0x3a8] sm:$0xff]  ;;  %v1586_v24 = vld [vmem:[#allocation2 + $0x400] sm:$0xff] }
 0x708   :  { %2998 = vmatprep.subr.bf16.mxu0 %v3475_v13  ;;  %v3586_v13 = vcombine.low %v1570_v8, %v1574_v9  ;;  %v3589_v15 = vcombine.high %v1571_v10, %v1575_v12  ;;  %v1622_v8 = vld [vmem:[#allocation2 + $0x520] sm:$0xff]  ;;  %v1619_v9 = vld [vmem:[#allocation2 + $0x508] sm:$0xff] }
 0x70a   :  { %3473 = vmatmul.mubr.msk.f32.vlgmr.msra.gmra.mrb[20].mxu0 %vm1296_vm6, %v4196_v14  ;;  %v3588_v14 = vcombine.low %v1571_v10, %v1575_v12  ;;  %3108 = vmatprep.subr.bf16.mxu1 %v3589_v15  ;;  %v1623_v10 = vld [vmem:[#allocation2 + $0x528] sm:$0xff]  ;;  %v1626_v15 = vld [vmem:[#allocation2 + $0x540] sm:$0xff] }
 0x70b   :  { %2999 = vmatpush1.bf16.msra.mxu0 %v3474_v17  ;;  %v1582_v17 = vld [vmem:[#allocation2 + $0x3e0] sm:$0xff] }
 0x70c   :  { %3000 = vmatprep.subr.bf16.mxu0 %v3483_v18  ;;  %v1579_v18 = vld [vmem:[#allocation2 + $0x3c8] sm:$0xff]  ;;  %3109 = vmatpush1.bf16.msra.mxu1 %v3588_v14  ;;  %v3595_v19 = vcombine.high %v1578_v16, %v1582_v17  ;;  %v3637_v14 = vcombine.high %v1619_v9, %v1623_v10 }
 0x70d   :  { %v3597_v23 = vcombine.high %v1579_v18, %v1583_v20 }
 0x70f   :  { %3001 = vmatpush1.bf16.msra.mxu0 %v3482_v21  ;;  %v3594_v21 = vcombine.low %v1578_v16, %v1582_v17  ;;  %3110 = vmatprep.subr.bf16.mxu1 %v3597_v23  ;;  %v1630_v16 = vld [vmem:[#allocation2 + $0x560] sm:$0xff]  ;;  %v1627_v17 = vld [vmem:[#allocation2 + $0x548] sm:$0xff] }
 0x710   :  { %3002 = vmatprep.subr.bf16.mxu0 %v3491_v22  ;;  %v3596_v22 = vcombine.low %v1579_v18, %v1583_v20  ;;  %v1631_v18 = vld [vmem:[#allocation2 + $0x568] sm:$0xff]  ;;  %v3636_v20 = vcombine.low %v1619_v9, %v1623_v10  ;;  %v1634_v23 = vld [vmem:[#allocation2 + $0x580] sm:$0xff] }
 0x712   :  { %3111 = vmatpush1.bf16.msra.mxu1 %v3596_v22  ;;  %v3645_v22 = vcombine.high %v1627_v17, %v1631_v18 }
 0x713   :  { %3003 = vmatpush1.bf16.msra.mxu0 %v3490_v53  ;;  %v1590_v53 = vld [vmem:[#allocation2 + $0x420] sm:$0xff] }
 0x714   :  { %3004 = vmatprep.subr.bf16.mxu0 %v3499_v54  ;;  %v1587_v54 = vld [vmem:[#allocation2 + $0x408] sm:$0xff]  ;;  %v3603_v25 = vcombine.high %v1586_v24, %v1590_v53 }
 0x715   :  { %v3605_v28 = vcombine.high %v1587_v54, %v1591_v26 }
 0x717   :  { %3005 = vmatpush1.bf16.msra.mxu0 %v3498_v0  ;;  %v3602_v0 = vcombine.low %v1586_v24, %v1590_v53  ;;  %3121 = vmatprep.subr.bf16.mxu1 %v3605_v28  ;;  %v1638_v24 = vld [vmem:[#allocation2 + $0x5a0] sm:$0xff]  ;;  %v1635_v53 = vld [vmem:[#allocation2 + $0x588] sm:$0xff] }
 0x718   :  { %3006 = vmatprep.subr.bf16.mxu0 %v3507_v27  ;;  %v3604_v27 = vcombine.low %v1587_v54, %v1591_v26  ;;  %v1639_v54 = vld [vmem:[#allocation2 + $0x5a8] sm:$0xff]  ;;  %v3644_v26 = vcombine.low %v1627_v17, %v1631_v18  ;;  %v1642_v28 = vld [vmem:[#allocation2 + $0x5c0] sm:$0xff] }
 0x71b   :  { %3007 = vmatpush1.bf16.msra.mxu0 %v3506_v31 }
 0x71c   :  { %3008 = vmatprep.subr.bf16.mxu0 %v3515_v32 }
 0x71f   :  { %3009 = vmatpush1.bf16.msra.mxu0 %v3514_v35 }
 0x720   :  { %3010 = vmatprep.subr.bf16.mxu0 %v3523_v36 }
 0x723   :  { %3011 = vmatpush1.bf16.msra.mxu0 %v3522_v39 }
 0x724   :  { %3012 = vmatprep.subr.bf16.mxu0 %v3531_v40 }
 0x727   :  { %3013 = vmatpush1.bf16.msra.mxu0 %v3530_v43  ;;  %v1599_v43 = vld [vmem:[#allocation2 + $0x468] sm:$0xff] }
 0x728   :  { %3014 = vmatprep.subr.bf16.mxu0 %v3539_v44  ;;  %v3612_v59 = vcombine.low %v1595_v42, %v1599_v43 }
 0x72b   :  { %3015 = vmatpush1.bf16.msra.mxu0 %v3538_v47 }
 0x72c   :  { %3016 = vmatprep.subr.bf16.mxu0 %v3547_v48  ;;  %v3613_v48 = vcombine.high %v1595_v42, %v1599_v43 }
 0x72f   :  { %3017 = vmatpush1.bf16.msra.mxu0 %v3546_v30  ;;  %v1607_v30 = vld [vmem:[#allocation2 + $0x4a8] sm:$0xff] }
 0x730   :  { %3018 = vmatprep.subr.bf16.mxu0 %v3555_v57  ;;  %v3620_v4 = vcombine.low %v1603_v50, %v1607_v30 }
 0x733   :  { %3019 = vmatpush1.bf16.msra.mxu0 %v3554_v60 }
 0x734   :  { %3020 = vmatprep.subr.bf16.mxu0 %v3563_v61  ;;  %v3621_v61 = vcombine.high %v1603_v50, %v1607_v30 }
 0x737   :  { %3021 = vmatpush1.bf16.msra.mxu0 %v3562_v1  ;;  %v1611_v1 = vld [vmem:[#allocation2 + $0x4c8] sm:$0xff] }
 0x738   :  { %3022 = vmatprep.subr.bf16.mxu0 %v3571_v2  ;;  %v1615_v2 = vld [vmem:[#allocation2 + $0x4e8] sm:$0xff] }
 0x739   :  { %v3628_v12 = vcombine.low %v1611_v1, %v1615_v2 }
 0x73b   :  { %3023 = vmatpush1.bf16.msra.mxu0 %v3570_v5  ;;  %v3627_v5 = vcombine.high %v1610_v62, %v1614_v63 }
 0x73c   :  { %3024 = vmatprep.subr.bf16.mxu0 %v3579_v6  ;;  %v3629_v6 = vcombine.high %v1611_v1, %v1615_v2 }
 0x73f   :  { %3025 = vmatpush1.bf16.msra.mxu0 %v3578_v7  ;;  %v1618_v7 = vld [vmem:[#allocation2 + $0x500] sm:$0xff] }
 0x740   :  { %3026 = vmatprep.subr.bf16.mxu0 %v3587_v11  ;;  %v3626_v11 = vcombine.low %v1610_v62, %v1614_v63 }
 0x743   :  { %3027 = vmatpush1.bf16.msra.mxu0 %v3586_v13  ;;  %v3635_v13 = vcombine.high %v1618_v7, %v1622_v8 }
 0x744   :  { %3028 = vmatprep.subr.bf16.mxu0 %v3595_v19  ;;  %v3634_v19 = vcombine.low %v1618_v7, %v1622_v8 }
 0x747   :  { %3029 = vmatpush1.bf16.msra.mxu0 %v3594_v21  ;;  %v3643_v21 = vcombine.high %v1626_v15, %v1630_v16 }
 0x748   :  { %3039 = vmatprep.subr.bf16.mxu0 %v3603_v25  ;;  %v3642_v25 = vcombine.low %v1626_v15, %v1630_v16 }
 0x7d9   :  { %v1366_v29 = vpop.f32.mrb[18].mxu0 }
 0x7da   :  { %v1442_v31 = vmul.f32 %v1366_v29, %v4971_v51  ;;  %v1368_v32 = vpop.f32.mrb[19].mxu0  ;;  %v1646_v29 = vld [vmem:[#allocation2 + $0x5e0] sm:$0xff] }
 0x7db   :  { %v1443_v33 = vmul.f32 %v1368_v32, %v4975_v55  ;;  %v3611_v55 = vcombine.high %v1594_v37, %v1598_v38  ;;  %v1647_v32 = vld [vmem:[#allocation2 + $0x5e8] sm:$0xff]  ;;  %v1650_v37 = vld [vmem:[#allocation2 + $0x600] sm:$0xff]  ;;  %v3658_v42 = vcombine.low %v1642_v28, %v1646_v29 }
 0x7dc   :  { %vm1446_vm7 = vcmp.ge.f32.partialorder %v1442_v31, 0.0  ;;  %v1450_v34 = vmul.f32 0.01, %v1442_v31  ;;  %v1654_v38 = vld [vmem:[#allocation2 + $0x620] sm:$0xff] }
 0x7dd   :  { %vm1447_vm8 = vcmp.ge.f32.partialorder %v1443_v33, 0.0  ;;  %v1451_v35 = vmul.f32 0.01, %v1443_v33  ;;  %v1437_v36 = vpop.f32.mrb[20].mxu0 }
 0x7de   :  { %v1454_v39 = vsel %vm1446_vm7, %v1442_v31, %v1450_v34  ;;  %v5004_v40 = vmul.f32 %v1437_v36, %v4973_v52  ;;  %v1439_v41 = vpop.f32.mrb[21].mxu0  ;;  %v1606_v52 = vld [vmem:[#allocation2 + $0x4a0] sm:$0xff]  ;;  %v1643_v31 = vld [vmem:[#allocation2 + $0x5c8] sm:$0xff]  ;;  %v3652_v34 = vcombine.low %v1635_v53, %v1639_v54 }
 0x7df   :  { %v1455_v44 = vsel %vm1447_vm8, %v1443_v33, %v1451_v35  ;;  %v1445_v51 = vmul.f32 %v1439_v41, %v4977_v56  ;;  %v5009_v46 = vpack.c.bf16 %v1454_v39, %v1454_v39  ;;  %v3619_v60 = vcombine.high %v1602_v49, %v1606_v52  ;;  %v1651_v39 = vld [vmem:[#allocation2 + $0x608] sm:$0xff] }
 0x7e0   :  { %v5007_v45 = vpack.c.bf16 %v1455_v44, %v1455_v44  ;;  %v3618_v3 = vcombine.low %v1602_v49, %v1606_v52  ;;  %v3650_v33 = vcombine.low %v1634_v23, %v1638_v24  ;;  %v3659_v35 = vcombine.high %v1642_v28, %v1646_v29  ;;  %v1655_v41 = vld [vmem:[#allocation2 + $0x628] sm:$0xff] }
 0x7e1   :  { %vm1449_vm9 = vcmp.ge.f32.partialorder %v1445_v51, 0.0  ;;  %v1453_v47 = vmul.f32 0.01, %v1445_v51  ;;  %v3661_v36 = vcombine.high %v1643_v31, %v1647_v32  ;;  %v3660_v43 = vcombine.low %v1643_v31, %v1647_v32  ;;  %v1663_v49 = vld [vmem:[#allocation2 + $0x668] sm:$0xff] }
 0x7e2   :  { %3030 = vmatprep.mubr.bf16.mxu0 %v5007_v45  ;;  %3112 = vmatprep.mubr.bf16.mxu1 %v5007_v45  ;;  %v3667_v44 = vcombine.high %v1650_v37, %v1654_v38  ;;  %v3666_v52 = vcombine.low %v1650_v37, %v1654_v38  ;;  %v3668_v50 = vcombine.low %v1651_v39, %v1655_v41  ;;  %vm1448_vm10 = vcmp.ge.f32.partialorder %v5004_v40, 0.0 }
 0x7e3   :  { %v1457_v57 = vsel %vm1449_vm9, %v1445_v51, %v1453_v47  ;;  %3031 = vmatmul.mubr.bf16.vlgmr.msra.gmra.mrb[24].mxu0 %v5009_v46  ;;  %3113 = vmatmul.mubr.bf16.vlgmr.msra.gmra.mrb[12].mxu1 %v5009_v46  ;;  %v3669_v51 = vcombine.high %v1651_v39, %v1655_v41  ;;  %v1662_v47 = vld [vmem:[#allocation2 + $0x660] sm:$0xff] }
 0x7e4   :  { %v5015_v56 = vpack.c.bf16 %v1457_v57, %v1457_v57  ;;  %3040 = vmatpush1.bf16.msra.mxu0 %v3602_v0  ;;  %3122 = vmatpush1.bf16.msra.mxu1 %v3604_v27  ;;  %v3651_v0 = vcombine.high %v1634_v23, %v1638_v24  ;;  %v3653_v27 = vcombine.high %v1635_v53, %v1639_v54 }
 0x7e5   :  { %3041 = vmatprep.subr.bf16.mxu0 %v3611_v55  ;;  %3123 = vmatprep.subr.bf16.mxu1 %v3613_v48  ;;  %v1658_v55 = vld [vmem:[#allocation2 + $0x640] sm:$0xff]  ;;  %v1659_v48 = vld [vmem:[#allocation2 + $0x648] sm:$0xff] }
 0x7e6   :  { %3071 = vmatprep.mubr.bf16.mxu0 %v5015_v56  ;;  %3153 = vmatprep.mubr.bf16.mxu1 %v5015_v56  ;;  %v3675_v30 = vcombine.high %v1658_v55, %v1662_v47  ;;  %v3677_v57 = vcombine.high %v1659_v48, %v1663_v49  ;;  %v3674_v62 = vcombine.low %v1658_v55, %v1662_v47  ;;  %v1465_v55 = vld [vmem:[#allocation2 + $0x38] sm:$0xff] }
 0x7e7   :  { %v3676_v63 = vcombine.low %v1659_v48, %v1663_v49 }
 0x7e8   :  { %3042 = vmatpush1.bf16.msra.mxu0 %v3610_v58  ;;  %3124 = vmatpush1.bf16.msra.mxu1 %v3612_v59  ;;  %v1666_v58 = vld [vmem:[#allocation2 + $0x680] sm:$0xff] }
 0x7e9   :  { %3043 = vmatprep.subr.bf16.mxu0 %v3619_v60  ;;  %3125 = vmatprep.subr.bf16.mxu1 %v3621_v61  ;;  %v1670_v59 = vld [vmem:[#allocation2 + $0x6a0] sm:$0xff]  ;;  %v1667_v60 = vld [vmem:[#allocation2 + $0x688] sm:$0xff] }
 0x7ea   :  { %v1671_v61 = vld [vmem:[#allocation2 + $0x6a8] sm:$0xff]  ;;  %v3683_v1 = vcombine.high %v1666_v58, %v1670_v59  ;;  %v3682_v7 = vcombine.low %v1666_v58, %v1670_v59  ;;  %v1469_v58 = vld [vmem:[#allocation2 + $0x58] sm:$0xff] }
 0x7eb   :  { %v3685_v2 = vcombine.high %v1667_v60, %v1671_v61  ;;  %v3684_v8 = vcombine.low %v1667_v60, %v1671_v61  ;;  %v1473_v59 = vld [vmem:[#allocation2 + $0x78] sm:$0xff] }
 0x7ec   :  { %3044 = vmatpush1.bf16.msra.mxu0 %v3618_v3  ;;  %3126 = vmatpush1.bf16.msra.mxu1 %v3620_v4  ;;  %v1674_v3 = vld [vmem:[#allocation2 + $0x6c0] sm:$0xff] }
 0x7ed   :  { %3045 = vmatprep.subr.bf16.mxu0 %v3627_v5  ;;  %3127 = vmatprep.subr.bf16.mxu1 %v3629_v6  ;;  %v1678_v4 = vld [vmem:[#allocation2 + $0x6e0] sm:$0xff]  ;;  %v1675_v5 = vld [vmem:[#allocation2 + $0x6c8] sm:$0xff] }
 0x7ee   :  { %v1679_v6 = vld [vmem:[#allocation2 + $0x6e8] sm:$0xff]  ;;  %v3691_v9 = vcombine.high %v1674_v3, %v1678_v4  ;;  %v3690_v15 = vcombine.low %v1674_v3, %v1678_v4  ;;  %v1480_v3 = vld [vmem:[#allocation2 + $0xb0] sm:$0xff]  ;;  %v1481_v4 = vld [vmem:[#allocation2 + $0xb8] sm:$0xff] }
 0x7ef   :  { %v3693_v10 = vcombine.high %v1675_v5, %v1679_v6  ;;  %v3692_v16 = vcombine.low %v1675_v5, %v1679_v6  ;;  %v3488_v6 = vcombine.low %v1469_v58, %v1473_v59 }
 0x7f0   :  { %3046 = vmatpush1.bf16.msra.mxu0 %v3626_v11  ;;  %3128 = vmatpush1.bf16.msra.mxu1 %v3628_v12  ;;  %v1682_v11 = vld [vmem:[#allocation2 + $0x700] sm:$0xff] }
 0x7f1   :  { %3047 = vmatprep.subr.bf16.mxu0 %v3635_v13  ;;  %3129 = vmatprep.subr.bf16.mxu1 %v3637_v14  ;;  %v1686_v12 = vld [vmem:[#allocation2 + $0x720] sm:$0xff]  ;;  %v1683_v13 = vld [vmem:[#allocation2 + $0x708] sm:$0xff] }
 0x7f2   :  { %v1687_v14 = vld [vmem:[#allocation2 + $0x728] sm:$0xff]  ;;  %v3699_v17 = vcombine.high %v1682_v11, %v1686_v12  ;;  %v3698_v23 = vcombine.low %v1682_v11, %v1686_v12  ;;  %v1485_v11 = vld [vmem:[#allocation2 + $0xd8] sm:$0xff] }
 0x7f3   :  { %v3701_v18 = vcombine.high %v1683_v13, %v1687_v14  ;;  %v3700_v24 = vcombine.low %v1683_v13, %v1687_v14  ;;  %v1489_v12 = vld [vmem:[#allocation2 + $0xf8] sm:$0xff] }
 0x7f4   :  { %3048 = vmatpush1.bf16.msra.mxu0 %v3634_v19  ;;  %3130 = vmatpush1.bf16.msra.mxu1 %v3636_v20  ;;  %v1690_v19 = vld [vmem:[#allocation2 + $0x740] sm:$0xff] }
 0x7f5   :  { %3049 = vmatprep.subr.bf16.mxu0 %v3643_v21  ;;  %3131 = vmatprep.subr.bf16.mxu1 %v3645_v22  ;;  %v1694_v20 = vld [vmem:[#allocation2 + $0x760] sm:$0xff]  ;;  %v1691_v21 = vld [vmem:[#allocation2 + $0x748] sm:$0xff] }
 0x7f6   :  { %v1695_v22 = vld [vmem:[#allocation2 + $0x768] sm:$0xff]  ;;  %v3707_v53 = vcombine.high %v1690_v19, %v1694_v20  ;;  %v3706_v28 = vcombine.low %v1690_v19, %v1694_v20  ;;  %v1497_v19 = vld [vmem:[#allocation2 + $0x138] sm:$0xff] }
 0x7f7   :  { %v3709_v54 = vcombine.high %v1691_v21, %v1695_v22  ;;  %v3708_v29 = vcombine.low %v1691_v21, %v1695_v22  ;;  %v3504_v21 = vcombine.low %v1485_v11, %v1489_v12 }
 0x7f8   :  { %3050 = vmatpush1.bf16.msra.mxu0 %v3642_v25  ;;  %3132 = vmatpush1.bf16.msra.mxu1 %v3644_v26  ;;  %v1698_v25 = vld [vmem:[#allocation2 + $0x780] sm:$0xff] }
 0x7f9   :  { %3051 = vmatprep.subr.bf16.mxu0 %v3651_v0  ;;  %3133 = vmatprep.subr.bf16.mxu1 %v3653_v27  ;;  %v1702_v26 = vld [vmem:[#allocation2 + $0x7a0] sm:$0xff]  ;;  %v1699_v0 = vld [vmem:[#allocation2 + $0x788] sm:$0xff] }
 0x7fa   :  { %v1703_v27 = vld [vmem:[#allocation2 + $0x7a8] sm:$0xff]  ;;  %v3715_v31 = vcombine.high %v1698_v25, %v1702_v26  ;;  %v3714_v37 = vcombine.low %v1698_v25, %v1702_v26  ;;  %v1505_v25 = vld [vmem:[#allocation2 + $0x178] sm:$0xff] }
 0x7fb   :  { %v3717_v32 = vcombine.high %v1699_v0, %v1703_v27  ;;  %v3716_v38 = vcombine.low %v1699_v0, %v1703_v27 }
 0x7fc   :  { %3052 = vmatpush1.bf16.msra.mxu0 %v3650_v33  ;;  %3134 = vmatpush1.bf16.msra.mxu1 %v3652_v34  ;;  %v1706_v33 = vld [vmem:[#allocation2 + $0x7c0] sm:$0xff] }
 0x7fd   :  { %3053 = vmatprep.subr.bf16.mxu0 %v3659_v35  ;;  %3135 = vmatprep.subr.bf16.mxu1 %v3661_v36  ;;  %v1710_v34 = vld [vmem:[#allocation2 + $0x7e0] sm:$0xff]  ;;  %v1707_v35 = vld [vmem:[#allocation2 + $0x7c8] sm:$0xff] }
 0x7fe   :  { %v1711_v36 = vld [vmem:[#allocation2 + $0x7e8] sm:$0xff]  ;;  %v3723_v39 = vcombine.high %v1706_v33, %v1710_v34  ;;  %v3722_v47 = vcombine.low %v1706_v33, %v1710_v34  ;;  %v1513_v33 = vld [vmem:[#allocation2 + $0x1b8] sm:$0xff] }
 0x7ff   :  { %v3725_v41 = vcombine.high %v1707_v35, %v1711_v36  ;;  %v3724_v48 = vcombine.low %v1707_v35, %v1711_v36 }
 0x800   :  { %3054 = vmatpush1.bf16.msra.mxu0 %v3658_v42  ;;  %3136 = vmatpush1.bf16.msra.mxu1 %v3660_v43  ;;  %v1460_v42 = vld [vmem:[#allocation2 + $0x10] sm:$0xff]  ;;  %v1452_v43 = vmul.f32 0.01, %v5004_v40 }
 0x801   :  { %3055 = vmatprep.subr.bf16.mxu0 %v3667_v44  ;;  %3137 = vmatprep.subr.bf16.mxu1 %v3669_v51  ;;  %v1464_v44 = vld [vmem:[#allocation2 + $0x30] sm:$0xff]  ;;  %v1461_v51 = vld [vmem:[#allocation2 + $0x18] sm:$0xff] }
 0x802   :  { %v3479_v49 = vcombine.high %v1460_v42, %v1464_v44  ;;  %v3478_v60 = vcombine.low %v1460_v42, %v1464_v44  ;;  %v1521_v42 = vld [vmem:[#allocation2 + $0x1f8] sm:$0xff] }
 0x804   :  { %3056 = vmatpush1.bf16.msra.mxu0 %v3666_v52  ;;  %3138 = vmatpush1.bf16.msra.mxu1 %v3668_v50  ;;  %v3481_v52 = vcombine.high %v1461_v51, %v1465_v55  ;;  %v1456_v50 = vsel %vm1448_vm10, %v5004_v40, %v1452_v43  ;;  %v1477_v40 = vld [vmem:[#allocation2 + $0x98] sm:$0xff] }
 0x805   :  { %3057 = vmatprep.subr.bf16.mxu0 %v3675_v30  ;;  %3139 = vmatprep.subr.bf16.mxu1 %v3677_v57  ;;  %v1468_v30 = vld [vmem:[#allocation2 + $0x50] sm:$0xff]  ;;  %v5022_v61 = vpack.c.bf16 %v1456_v50, %v1456_v50  ;;  %v3496_v14 = vcombine.low %v1477_v40, %v1481_v4 }
 0x806   :  { %v1472_v57 = vld [vmem:[#allocation2 + $0x70] sm:$0xff] }
 0x807   :  { %v3486_v5 = vcombine.low %v1468_v30, %v1472_v57 }
 0x808   :  { %3058 = vmatpush1.bf16.msra.mxu0 %v3674_v62  ;;  %3140 = vmatpush1.bf16.msra.mxu1 %v3676_v63  ;;  %v3480_v62 = vcombine.low %v1461_v51, %v1465_v55  ;;  %v3487_v63 = vcombine.high %v1468_v30, %v1472_v57 }
 0x809   :  { %3059 = vmatprep.subr.bf16.mxu0 %v3683_v1  ;;  %3141 = vmatprep.subr.bf16.mxu1 %v3685_v2  ;;  %v3489_v1 = vcombine.high %v1469_v58, %v1473_v59  ;;  %v1476_v2 = vld [vmem:[#allocation2 + $0x90] sm:$0xff] }
 0x80a   :  { %v3494_v13 = vcombine.low %v1476_v2, %v1480_v3  ;;  %v1532_v59 = vld [vmem:[#allocation2 + $0x250] sm:$0xff] }
 0x80c   :  { %3060 = vmatpush1.bf16.msra.mxu0 %v3682_v7  ;;  %3142 = vmatpush1.bf16.msra.mxu1 %v3684_v8  ;;  %v3495_v7 = vcombine.high %v1476_v2, %v1480_v3  ;;  %v3497_v8 = vcombine.high %v1477_v40, %v1481_v4  ;;  %v1540_v4 = vld [vmem:[#allocation2 + $0x290] sm:$0xff] }
 0x80d   :  { %3061 = vmatprep.subr.bf16.mxu0 %v3691_v9  ;;  %3143 = vmatprep.subr.bf16.mxu1 %v3693_v10  ;;  %v1484_v9 = vld [vmem:[#allocation2 + $0xd0] sm:$0xff] }
 0x80e   :  { %v1488_v10 = vld [vmem:[#allocation2 + $0xf0] sm:$0xff] }
 0x80f   :  { %v3502_v20 = vcombine.low %v1484_v9, %v1488_v10 }
 0x810   :  { %3062 = vmatpush1.bf16.msra.mxu0 %v3690_v15  ;;  %3144 = vmatpush1.bf16.msra.mxu1 %v3692_v16  ;;  %v3503_v15 = vcombine.high %v1484_v9, %v1488_v10  ;;  %v3505_v16 = vcombine.high %v1485_v11, %v1489_v12  ;;  %v1548_v12 = vld [vmem:[#allocation2 + $0x2d0] sm:$0xff] }
 0x811   :  { %3063 = vmatprep.subr.bf16.mxu0 %v3699_v17  ;;  %3145 = vmatprep.subr.bf16.mxu1 %v3701_v18  ;;  %v1492_v17 = vld [vmem:[#allocation2 + $0x110] sm:$0xff] }
 0x812   :  { %v1496_v18 = vld [vmem:[#allocation2 + $0x130] sm:$0xff] }
 0x813   :  { %v3511_v22 = vcombine.high %v1492_v17, %v1496_v18  ;;  %v3510_v26 = vcombine.low %v1492_v17, %v1496_v18 }
 0x814   :  { %3064 = vmatpush1.bf16.msra.mxu0 %v3698_v23  ;;  %3146 = vmatpush1.bf16.msra.mxu1 %v3700_v24  ;;  %v1500_v24 = vld [vmem:[#allocation2 + $0x150] sm:$0xff] }
 0x815   :  { %3065 = vmatprep.subr.bf16.mxu0 %v3707_v53  ;;  %3147 = vmatprep.subr.bf16.mxu1 %v3709_v54  ;;  %v1504_v53 = vld [vmem:[#allocation2 + $0x170] sm:$0xff]  ;;  %v1501_v54 = vld [vmem:[#allocation2 + $0x158] sm:$0xff] }
 0x816   :  { %v3519_v27 = vcombine.high %v1500_v24, %v1504_v53  ;;  %v3518_v34 = vcombine.low %v1500_v24, %v1504_v53  ;;  %v3520_v35 = vcombine.low %v1501_v54, %v1505_v25 }
 0x818   :  { %3066 = vmatpush1.bf16.msra.mxu0 %v3706_v28  ;;  %3148 = vmatpush1.bf16.msra.mxu1 %v3708_v29  ;;  %v3521_v28 = vcombine.high %v1501_v54, %v1505_v25  ;;  %v1508_v29 = vld [vmem:[#allocation2 + $0x190] sm:$0xff] }
 0x819   :  { %3067 = vmatprep.subr.bf16.mxu0 %v3715_v31  ;;  %3149 = vmatprep.subr.bf16.mxu1 %v3717_v32  ;;  %v1512_v31 = vld [vmem:[#allocation2 + $0x1b0] sm:$0xff]  ;;  %v1509_v32 = vld [vmem:[#allocation2 + $0x198] sm:$0xff] }
 0x81a   :  { %v3527_v36 = vcombine.high %v1508_v29, %v1512_v31  ;;  %v3526_v43 = vcombine.low %v1508_v29, %v1512_v31  ;;  %v3528_v44 = vcombine.low %v1509_v32, %v1513_v33  ;;  %v1564_v25 = vld [vmem:[#allocation2 + $0x350] sm:$0xff] }
 0x81c   :  { %3068 = vmatpush1.bf16.msra.mxu0 %v3714_v37  ;;  %3150 = vmatpush1.bf16.msra.mxu1 %v3716_v38  ;;  %v3529_v37 = vcombine.high %v1509_v32, %v1513_v33  ;;  %v1516_v38 = vld [vmem:[#allocation2 + $0x1d0] sm:$0xff] }
 0x81d   :  { %3069 = vmatprep.subr.bf16.mxu0 %v3723_v39  ;;  %3151 = vmatprep.subr.bf16.mxu1 %v3725_v41  ;;  %v1520_v39 = vld [vmem:[#allocation2 + $0x1f0] sm:$0xff]  ;;  %v1517_v41 = vld [vmem:[#allocation2 + $0x1d8] sm:$0xff] }
 0x81e   :  { %v3535_v51 = vcombine.high %v1516_v38, %v1520_v39  ;;  %v3537_v55 = vcombine.high %v1517_v41, %v1521_v42  ;;  %v3534_v50 = vcombine.low %v1516_v38, %v1520_v39  ;;  %v3536_v30 = vcombine.low %v1517_v41, %v1521_v42  ;;  %v1572_v33 = vld [vmem:[#allocation2 + $0x390] sm:$0xff] }
 0x81f   :  { %v1580_v42 = vld [vmem:[#allocation2 + $0x3d0] sm:$0xff] }
 0x820   :  { %3070 = vmatpush1.bf16.msra.mxu0 %v3722_v47  ;;  %3152 = vmatpush1.bf16.msra.mxu1 %v3724_v48  ;;  %v1524_v47 = vld [vmem:[#allocation2 + $0x210] sm:$0xff] }
 0x821   :  { %3162 = vmatprep.subr.bf16.mxu0 %v3479_v49  ;;  %3244 = vmatprep.subr.bf16.mxu1 %v3481_v52  ;;  %v1528_v48 = vld [vmem:[#allocation2 + $0x230] sm:$0xff]  ;;  %v1525_v49 = vld [vmem:[#allocation2 + $0x218] sm:$0xff] }
 0x822   :  { %v1529_v52 = vld [vmem:[#allocation2 + $0x238] sm:$0xff]  ;;  %v3543_v57 = vcombine.high %v1524_v47, %v1528_v48 }
 0x823   :  { %3072 = vmatmul.mubr.bf16.vlgmr.msra.gmra.mrb[24].mxu0 %v5022_v61  ;;  %3154 = vmatmul.mubr.bf16.vlgmr.msra.gmra.mrb[12].mxu1 %v5022_v61  ;;  %v3545_v58 = vcombine.high %v1525_v49, %v1529_v52  ;;  %v3544_v2 = vcombine.low %v1525_v49, %v1529_v52  ;;  %v1588_v52 = vld [vmem:[#allocation2 + $0x410] sm:$0xff] }
 0x824   :  { %3163 = vmatpush1.bf16.msra.mxu0 %v3478_v60  ;;  %3194 = vmatprep.mubr.bf16.mxu0 %v5007_v45  ;;  %v1536_v60 = vld [vmem:[#allocation2 + $0x270] sm:$0xff] }
 0x825   :  { %3245 = vmatpush1.bf16.msra.mxu1 %v3480_v62  ;;  %3276 = vmatprep.mubr.bf16.mxu1 %v5007_v45  ;;  %v1493_v45 = vld [vmem:[#allocation2 + $0x118] sm:$0xff]  ;;  %v3551_v3 = vcombine.high %v1532_v59, %v1536_v60 }
 0x826   :  { %3164 = vmatprep.subr.bf16.mxu0 %v3487_v63  ;;  %3246 = vmatprep.subr.bf16.mxu1 %v3489_v1  ;;  %v3513_v23 = vcombine.high %v1493_v45, %v1497_v19  ;;  %v3512_v0 = vcombine.low %v1493_v45, %v1497_v19  ;;  %v1533_v62 = vld [vmem:[#allocation2 + $0x258] sm:$0xff]  ;;  %v3542_v1 = vcombine.low %v1524_v47, %v1528_v48  ;;  %v1556_v19 = vld [vmem:[#allocation2 + $0x310] sm:$0xff] }
 0x827   :  { %v1537_v63 = vld [vmem:[#allocation2 + $0x278] sm:$0xff] }
 0x828   :  { %3165 = vmatpush1.bf16.msra.mxu0 %v3486_v5  ;;  %v3553_v40 = vcombine.high %v1533_v62, %v1537_v63  ;;  %v1544_v5 = vld [vmem:[#allocation2 + $0x2b0] sm:$0xff]  ;;  %v3552_v9 = vcombine.low %v1533_v62, %v1537_v63 }
 0x829   :  { %3247 = vmatpush1.bf16.msra.mxu1 %v3488_v6  ;;  %3166 = vmatprep.subr.bf16.mxu0 %v3495_v7  ;;  %v1541_v6 = vld [vmem:[#allocation2 + $0x298] sm:$0xff]  ;;  %v3559_v10 = vcombine.high %v1540_v4, %v1544_v5  ;;  %v1596_v63 = vld [vmem:[#allocation2 + $0x450] sm:$0xff] }
 0x82a   :  { %3248 = vmatprep.subr.bf16.mxu1 %v3497_v8  ;;  %v1545_v7 = vld [vmem:[#allocation2 + $0x2b8] sm:$0xff]  ;;  %v3550_v8 = vcombine.low %v1532_v59, %v1536_v60 }
 0x82b   :  { %v3561_v11 = vcombine.high %v1541_v6, %v1545_v7  ;;  %v3560_v17 = vcombine.low %v1541_v6, %v1545_v7  ;;  %v1604_v6 = vld [vmem:[#allocation2 + $0x490] sm:$0xff] }
 0x82c   :  { %3167 = vmatpush1.bf16.msra.mxu0 %v3494_v13  ;;  %v1552_v13 = vld [vmem:[#allocation2 + $0x2f0] sm:$0xff] }
 0x82d   :  { %3249 = vmatpush1.bf16.msra.mxu1 %v3496_v14  ;;  %3168 = vmatprep.subr.bf16.mxu0 %v3503_v15  ;;  %v1549_v14 = vld [vmem:[#allocation2 + $0x2d8] sm:$0xff]  ;;  %v3567_v18 = vcombine.high %v1548_v12, %v1552_v13  ;;  %v1608_v7 = vld [vmem:[#allocation2 + $0x4b0] sm:$0xff] }
 0x82e   :  { %3250 = vmatprep.subr.bf16.mxu1 %v3505_v16  ;;  %v1553_v15 = vld [vmem:[#allocation2 + $0x2f8] sm:$0xff]  ;;  %v3558_v16 = vcombine.low %v1540_v4, %v1544_v5 }
 0x82f   :  { %v3569_v45 = vcombine.high %v1549_v14, %v1553_v15  ;;  %v3568_v24 = vcombine.low %v1549_v14, %v1553_v15  ;;  %v1612_v15 = vld [vmem:[#allocation2 + $0x4d0] sm:$0xff] }
 0x830   :  { %3169 = vmatpush1.bf16.msra.mxu0 %v3502_v20  ;;  %v1560_v20 = vld [vmem:[#allocation2 + $0x330] sm:$0xff] }
 0x831   :  { %3251 = vmatpush1.bf16.msra.mxu1 %v3504_v21  ;;  %3170 = vmatprep.subr.bf16.mxu0 %v3511_v22  ;;  %v1557_v21 = vld [vmem:[#allocation2 + $0x318] sm:$0xff]  ;;  %v3575_v53 = vcombine.high %v1556_v19, %v1560_v20 }
 0x832   :  { %3252 = vmatprep.subr.bf16.mxu1 %v3513_v23  ;;  %v1561_v22 = vld [vmem:[#allocation2 + $0x338] sm:$0xff]  ;;  %v3566_v23 = vcombine.low %v1548_v12, %v1552_v13  ;;  %v3623_v13 = vcombine.high %v1604_v6, %v1608_v7 }
 0x833   :  { %v3577_v54 = vcombine.high %v1557_v21, %v1561_v22  ;;  %v3576_v29 = vcombine.low %v1557_v21, %v1561_v22  ;;  %v1620_v21 = vld [vmem:[#allocation2 + $0x510] sm:$0xff] }
 0x834   :  { %3171 = vmatpush1.bf16.msra.mxu0 %v3510_v26  ;;  %v1568_v26 = vld [vmem:[#allocation2 + $0x370] sm:$0xff] }
 0x835   :  { %3253 = vmatpush1.bf16.msra.mxu1 %v3512_v0  ;;  %3172 = vmatprep.subr.bf16.mxu0 %v3519_v27  ;;  %v1565_v0 = vld [vmem:[#allocation2 + $0x358] sm:$0xff]  ;;  %v3583_v31 = vcombine.high %v1564_v25, %v1568_v26  ;;  %v1624_v22 = vld [vmem:[#allocation2 + $0x530] sm:$0xff] }
 0x836   :  { %3254 = vmatprep.subr.bf16.mxu1 %v3521_v28  ;;  %v1569_v27 = vld [vmem:[#allocation2 + $0x378] sm:$0xff]  ;;  %v3574_v28 = vcombine.low %v1556_v19, %v1560_v20 }
 0x837   :  { %v3585_v32 = vcombine.high %v1565_v0, %v1569_v27  ;;  %v3584_v38 = vcombine.low %v1565_v0, %v1569_v27  ;;  %v1632_v0 = vld [vmem:[#allocation2 + $0x570] sm:$0xff]  ;;  %v1629_v27 = vld [vmem:[#allocation2 + $0x558] sm:$0xff] }
 0x838   :  { %3173 = vmatpush1.bf16.msra.mxu0 %v3518_v34  ;;  %v1576_v34 = vld [vmem:[#allocation2 + $0x3b0] sm:$0xff] }
 0x839   :  { %3255 = vmatpush1.bf16.msra.mxu1 %v3520_v35  ;;  %3174 = vmatprep.subr.bf16.mxu0 %v3527_v36  ;;  %v1573_v35 = vld [vmem:[#allocation2 + $0x398] sm:$0xff]  ;;  %v3591_v39 = vcombine.high %v1572_v33, %v1576_v34 }
 0x83a   :  { %3256 = vmatprep.subr.bf16.mxu1 %v3529_v37  ;;  %v1577_v36 = vld [vmem:[#allocation2 + $0x3b8] sm:$0xff]  ;;  %v3582_v37 = vcombine.low %v1564_v25, %v1568_v26  ;;  %v1628_v26 = vld [vmem:[#allocation2 + $0x550] sm:$0xff] }
 0x83b   :  { %v3593_v41 = vcombine.high %v1573_v35, %v1577_v36  ;;  %v3592_v47 = vcombine.low %v1573_v35, %v1577_v36  ;;  %v1640_v35 = vld [vmem:[#allocation2 + $0x5b0] sm:$0xff]  ;;  %v1637_v36 = vld [vmem:[#allocation2 + $0x598] sm:$0xff] }
 0x83c   :  { %3175 = vmatpush1.bf16.msra.mxu0 %v3526_v43  ;;  %v1584_v43 = vld [vmem:[#allocation2 + $0x3f0] sm:$0xff] }
 0x83d   :  { %3257 = vmatpush1.bf16.msra.mxu1 %v3528_v44  ;;  %3176 = vmatprep.subr.bf16.mxu0 %v3535_v51  ;;  %v1581_v44 = vld [vmem:[#allocation2 + $0x3d8] sm:$0xff]  ;;  %v3599_v48 = vcombine.high %v1580_v42, %v1584_v43 }
 0x83e   :  { %3258 = vmatprep.subr.bf16.mxu1 %v3537_v55  ;;  %v1585_v51 = vld [vmem:[#allocation2 + $0x3f8] sm:$0xff]  ;;  %v3590_v55 = vcombine.low %v1572_v33, %v1576_v34  ;;  %v1636_v34 = vld [vmem:[#allocation2 + $0x590] sm:$0xff] }
 0x83f   :  { %v3601_v49 = vcombine.high %v1581_v44, %v1585_v51  ;;  %v3600_v59 = vcombine.low %v1581_v44, %v1585_v51  ;;  %v1648_v44 = vld [vmem:[#allocation2 + $0x5f0] sm:$0xff]  ;;  %v1645_v51 = vld [vmem:[#allocation2 + $0x5d8] sm:$0xff] }
 0x840   :  { %3177 = vmatpush1.bf16.msra.mxu0 %v3534_v50  ;;  %v1592_v50 = vld [vmem:[#allocation2 + $0x430] sm:$0xff] }
 0x841   :  { %3259 = vmatpush1.bf16.msra.mxu1 %v3536_v30  ;;  %3178 = vmatprep.subr.bf16.mxu0 %v3543_v57  ;;  %v1589_v30 = vld [vmem:[#allocation2 + $0x418] sm:$0xff]  ;;  %v3607_v60 = vcombine.high %v1588_v52, %v1592_v50 }
 0x842   :  { %3260 = vmatprep.subr.bf16.mxu1 %v3545_v58  ;;  %v1593_v57 = vld [vmem:[#allocation2 + $0x438] sm:$0xff]  ;;  %v3598_v58 = vcombine.low %v1580_v42, %v1584_v43  ;;  %v1644_v43 = vld [vmem:[#allocation2 + $0x5d0] sm:$0xff] }
 0x843   :  { %v3609_v62 = vcombine.high %v1589_v30, %v1593_v57  ;;  %v3608_v4 = vcombine.low %v1589_v30, %v1593_v57  ;;  %v1656_v30 = vld [vmem:[#allocation2 + $0x630] sm:$0xff]  ;;  %v1653_v57 = vld [vmem:[#allocation2 + $0x618] sm:$0xff] }
 0x844   :  { %3179 = vmatpush1.bf16.msra.mxu0 %v3542_v1  ;;  %v1600_v1 = vld [vmem:[#allocation2 + $0x470] sm:$0xff] }
 0x845   :  { %3261 = vmatpush1.bf16.msra.mxu1 %v3544_v2  ;;  %3180 = vmatprep.subr.bf16.mxu0 %v3551_v3  ;;  %v3606_v2 = vcombine.low %v1588_v52, %v1592_v50  ;;  %v1597_v3 = vld [vmem:[#allocation2 + $0x458] sm:$0xff]  ;;  %v3615_v5 = vcombine.high %v1596_v63, %v1600_v1  ;;  %v1652_v50 = vld [vmem:[#allocation2 + $0x610] sm:$0xff] }
 0x846   :  { %3262 = vmatprep.subr.bf16.mxu1 %v3553_v40  ;;  %v1601_v40 = vld [vmem:[#allocation2 + $0x478] sm:$0xff] }
 0x847   :  { %v3616_v12 = vcombine.low %v1597_v3, %v1601_v40 }
 0x848   :  { %3181 = vmatpush1.bf16.msra.mxu0 %v3550_v8  ;;  %v3617_v8 = vcombine.high %v1597_v3, %v1601_v40  ;;  %v1661_v3 = vld [vmem:[#allocation2 + $0x658] sm:$0xff] }
 0x849   :  { %3263 = vmatpush1.bf16.msra.mxu1 %v3552_v9  ;;  %3182 = vmatprep.subr.bf16.mxu0 %v3559_v10  ;;  %v1605_v9 = vld [vmem:[#allocation2 + $0x498] sm:$0xff] }
 0x84a   :  { %3264 = vmatprep.subr.bf16.mxu1 %v3561_v11  ;;  %v1609_v10 = vld [vmem:[#allocation2 + $0x4b8] sm:$0xff]  ;;  %v3614_v11 = vcombine.low %v1596_v63, %v1600_v1  ;;  %v1660_v1 = vld [vmem:[#allocation2 + $0x650] sm:$0xff] }
 0x84b   :  { %v3625_v14 = vcombine.high %v1605_v9, %v1609_v10  ;;  %v1665_v40 = vld [vmem:[#allocation2 + $0x678] sm:$0xff] }
 0x84c   :  { %3183 = vmatpush1.bf16.msra.mxu0 %v3558_v16  ;;  %v1616_v16 = vld [vmem:[#allocation2 + $0x4f0] sm:$0xff] }
 0x84d   :  { %3265 = vmatpush1.bf16.msra.mxu1 %v3560_v17  ;;  %3184 = vmatprep.subr.bf16.mxu0 %v3567_v18  ;;  %v1613_v17 = vld [vmem:[#allocation2 + $0x4d8] sm:$0xff]  ;;  %v3631_v19 = vcombine.high %v1612_v15, %v1616_v16 }
 0x84e   :  { %3266 = vmatprep.subr.bf16.mxu1 %v3569_v45  ;;  %v1617_v18 = vld [vmem:[#allocation2 + $0x4f8] sm:$0xff]  ;;  %v3622_v45 = vcombine.low %v1604_v6, %v1608_v7  ;;  %v3681_v7 = vcombine.high %v1661_v3, %v1665_v40 }
 0x84f   :  { %v3633_v20 = vcombine.high %v1613_v17, %v1617_v18 }
 0x850   :  { %3185 = vmatpush1.bf16.msra.mxu0 %v3566_v23  ;;  %v1621_v23 = vld [vmem:[#allocation2 + $0x518] sm:$0xff] }
 0x851   :  { %3267 = vmatpush1.bf16.msra.mxu1 %v3568_v24  ;;  %3186 = vmatprep.subr.bf16.mxu0 %v3575_v53  ;;  %v1625_v24 = vld [vmem:[#allocation2 + $0x538] sm:$0xff]  ;;  %v3632_v53 = vcombine.low %v1613_v17, %v1617_v18  ;;  %v1680_v17 = vld [vmem:[#allocation2 + $0x6f0] sm:$0xff] }
 0x852   :  { %3268 = vmatprep.subr.bf16.mxu1 %v3577_v54  ;;  %v3639_v54 = vcombine.high %v1620_v21, %v1624_v22  ;;  %v3641_v25 = vcombine.high %v1621_v23, %v1625_v24  ;;  %v1677_v18 = vld [vmem:[#allocation2 + $0x6d8] sm:$0xff] }
 0x854   :  { %3187 = vmatpush1.bf16.msra.mxu0 %v3574_v28  ;;  %v1633_v28 = vld [vmem:[#allocation2 + $0x578] sm:$0xff] }
 0x855   :  { %3269 = vmatpush1.bf16.msra.mxu1 %v3576_v29  ;;  %3188 = vmatprep.subr.bf16.mxu0 %v3583_v31  ;;  %v3638_v29 = vcombine.low %v1620_v21, %v1624_v22  ;;  %v3640_v31 = vcombine.low %v1621_v23, %v1625_v24  ;;  %v3649_v33 = vcombine.high %v1629_v27, %v1633_v28  ;;  %v1684_v22 = vld [vmem:[#allocation2 + $0x710] sm:$0xff]  ;;  %v1685_v24 = vld [vmem:[#allocation2 + $0x718] sm:$0xff] }
 0x856   :  { %3270 = vmatprep.subr.bf16.mxu1 %v3585_v32  ;;  %v3647_v32 = vcombine.high %v1628_v26, %v1632_v0  ;;  %v1688_v23 = vld [vmem:[#allocation2 + $0x730] sm:$0xff] }
 0x858   :  { %3189 = vmatpush1.bf16.msra.mxu0 %v3582_v37  ;;  %v1641_v37 = vld [vmem:[#allocation2 + $0x5b8] sm:$0xff] }
 0x859   :  { %3271 = vmatpush1.bf16.msra.mxu1 %v3584_v38  ;;  %3190 = vmatprep.subr.bf16.mxu0 %v3591_v39  ;;  %v3646_v38 = vcombine.low %v1628_v26, %v1632_v0  ;;  %v3648_v39 = vcombine.low %v1629_v27, %v1633_v28  ;;  %v3657_v42 = vcombine.high %v1637_v36, %v1641_v37  ;;  %v1692_v0 = vld [vmem:[#allocation2 + $0x750] sm:$0xff]  ;;  %v1693_v28 = vld [vmem:[#allocation2 + $0x758] sm:$0xff] }
 0x85a   :  { %3272 = vmatprep.subr.bf16.mxu1 %v3593_v41  ;;  %v3655_v41 = vcombine.high %v1636_v34, %v1640_v35  ;;  %v1696_v27 = vld [vmem:[#allocation2 + $0x770] sm:$0xff] }
 0x85c   :  { %3191 = vmatpush1.bf16.msra.mxu0 %v3590_v55  ;;  %v1649_v55 = vld [vmem:[#allocation2 + $0x5f8] sm:$0xff] }
 0x85d   :  { %3273 = vmatpush1.bf16.msra.mxu1 %v3592_v47  ;;  %3192 = vmatprep.subr.bf16.mxu0 %v3599_v48  ;;  %v3654_v47 = vcombine.low %v1636_v34, %v1640_v35  ;;  %v3656_v48 = vcombine.low %v1637_v36, %v1641_v37  ;;  %v3665_v52 = vcombine.high %v1645_v51, %v1649_v55  ;;  %v1700_v35 = vld [vmem:[#allocation2 + $0x790] sm:$0xff]  ;;  %v1701_v37 = vld [vmem:[#allocation2 + $0x798] sm:$0xff] }
 0x85e   :  { %3274 = vmatprep.subr.bf16.mxu1 %v3601_v49  ;;  %v3663_v49 = vcombine.high %v1644_v43, %v1648_v44  ;;  %v1704_v36 = vld [vmem:[#allocation2 + $0x7b0] sm:$0xff] }
 0x860   :  { %3193 = vmatpush1.bf16.msra.mxu0 %v3598_v58  ;;  %v1657_v58 = vld [vmem:[#allocation2 + $0x638] sm:$0xff] }
 0x861   :  { %3275 = vmatpush1.bf16.msra.mxu1 %v3600_v59  ;;  %3203 = vmatprep.subr.bf16.mxu0 %v3607_v60  ;;  %v3662_v59 = vcombine.low %v1644_v43, %v1648_v44  ;;  %v3664_v60 = vcombine.low %v1645_v51, %v1649_v55  ;;  %v3673_v63 = vcombine.high %v1653_v57, %v1657_v58  ;;  %v1708_v44 = vld [vmem:[#allocation2 + $0x7d0] sm:$0xff]  ;;  %v1709_v55 = vld [vmem:[#allocation2 + $0x7d8] sm:$0xff] }
 0x862   :  { %3285 = vmatprep.subr.bf16.mxu1 %v3609_v62  ;;  %v3671_v62 = vcombine.high %v1652_v50, %v1656_v30  ;;  %v1712_v51 = vld [vmem:[#allocation2 + $0x7f0] sm:$0xff] }
 0x863   :  { %3195 = vmatmul.mubr.bf16.vlgmr.msra.gmra.mrb[28].mxu0 %v5009_v46 }
 0x864   :  { %3277 = vmatmul.mubr.bf16.vlgmr.msra.gmra.mrb[16].mxu1 %v5009_v46  ;;  %3204 = vmatpush1.bf16.msra.mxu0 %v3606_v2  ;;  %v3624_v46 = vcombine.low %v1605_v9, %v1609_v10  ;;  %v1664_v2 = vld [vmem:[#allocation2 + $0x670] sm:$0xff]  ;;  %v1669_v10 = vld [vmem:[#allocation2 + $0x698] sm:$0xff] }
 0x865   :  { %3235 = vmatprep.mubr.bf16.mxu0 %v5015_v56  ;;  %3286 = vmatpush1.bf16.msra.mxu1 %v3608_v4  ;;  %v3670_v4 = vcombine.low %v1652_v50, %v1656_v30  ;;  %v3679_v6 = vcombine.high %v1660_v1, %v1664_v2  ;;  %v1672_v9 = vld [vmem:[#allocation2 + $0x6b0] sm:$0xff]  ;;  %v3726_v30 = vcombine.low %v1708_v44, %v1712_v51 }
 0x866   :  { %3317 = vmatprep.mubr.bf16.mxu1 %v5015_v56  ;;  %3205 = vmatprep.subr.bf16.mxu0 %v3615_v5  ;;  %v3630_v56 = vcombine.low %v1612_v15, %v1616_v16  ;;  %v3672_v5 = vcombine.low %v1653_v57, %v1657_v58  ;;  %v1676_v16 = vld [vmem:[#allocation2 + $0x6d0] sm:$0xff]  ;;  %v4252_v58 = vmov 1983009808  }
 0x867   :  { %3287 = vmatprep.subr.bf16.mxu1 %v3617_v8  ;;  %v1668_v8 = vld [vmem:[#allocation2 + $0x690] sm:$0xff] }
 0x868   :  { %3206 = vmatpush1.bf16.msra.mxu0 %v3614_v11  ;;  %v1673_v11 = vld [vmem:[#allocation2 + $0x6b8] sm:$0xff] }
 0x869   :  { %3288 = vmatpush1.bf16.msra.mxu1 %v3616_v12  ;;  %3207 = vmatprep.subr.bf16.mxu0 %v3623_v13  ;;  %v3678_v12 = vcombine.low %v1660_v1, %v1664_v2  ;;  %v3680_v13 = vcombine.low %v1661_v3, %v1665_v40  ;;  %v3689_v15 = vcombine.high %v1669_v10, %v1673_v11 }
 0x86a   :  { %3289 = vmatprep.subr.bf16.mxu1 %v3625_v14  ;;  %v3687_v14 = vcombine.high %v1668_v8, %v1672_v9 }
 0x86c   :  { %3208 = vmatpush1.bf16.msra.mxu0 %v3622_v45  ;;  %v1681_v45 = vld [vmem:[#allocation2 + $0x6f8] sm:$0xff] }
 0x86d   :  { %3290 = vmatpush1.bf16.msra.mxu1 %v3624_v46  ;;  %3209 = vmatprep.subr.bf16.mxu0 %v3631_v19  ;;  %v3686_v46 = vcombine.low %v1668_v8, %v1672_v9  ;;  %v3688_v19 = vcombine.low %v1669_v10, %v1673_v11  ;;  %v3697_v21 = vcombine.high %v1677_v18, %v1681_v45 }
 0x86e   :  { %3291 = vmatprep.subr.bf16.mxu1 %v3633_v20  ;;  %v3695_v20 = vcombine.high %v1676_v16, %v1680_v17 }
 0x870   :  { %3210 = vmatpush1.bf16.msra.mxu0 %v3630_v56  ;;  %v1689_v56 = vld [vmem:[#allocation2 + $0x738] sm:$0xff] }
 0x871   :  { %3292 = vmatpush1.bf16.msra.mxu1 %v3632_v53  ;;  %3211 = vmatprep.subr.bf16.mxu0 %v3639_v54  ;;  %v3694_v53 = vcombine.low %v1676_v16, %v1680_v17  ;;  %v3696_v54 = vcombine.low %v1677_v18, %v1681_v45  ;;  %v3705_v26 = vcombine.high %v1685_v24, %v1689_v56 }
 0x872   :  { %3293 = vmatprep.subr.bf16.mxu1 %v3641_v25  ;;  %v3703_v25 = vcombine.high %v1684_v22, %v1688_v23 }
 0x874   :  { %3212 = vmatpush1.bf16.msra.mxu0 %v3638_v29  ;;  %v1697_v29 = vld [vmem:[#allocation2 + $0x778] sm:$0xff] }
 0x875   :  { %3294 = vmatpush1.bf16.msra.mxu1 %v3640_v31  ;;  %3213 = vmatprep.subr.bf16.mxu0 %v3647_v32  ;;  %v3702_v31 = vcombine.low %v1684_v22, %v1688_v23  ;;  %v3704_v32 = vcombine.low %v1685_v24, %v1689_v56  ;;  %v3713_v34 = vcombine.high %v1693_v28, %v1697_v29 }
 0x876   :  { %3295 = vmatprep.subr.bf16.mxu1 %v3649_v33  ;;  %v3711_v33 = vcombine.high %v1692_v0, %v1696_v27 }
 0x878   :  { %3214 = vmatpush1.bf16.msra.mxu0 %v3646_v38  ;;  %v1705_v38 = vld [vmem:[#allocation2 + $0x7b8] sm:$0xff] }
 0x879   :  { %3296 = vmatpush1.bf16.msra.mxu1 %v3648_v39  ;;  %3215 = vmatprep.subr.bf16.mxu0 %v3655_v41  ;;  %v3710_v39 = vcombine.low %v1692_v0, %v1696_v27  ;;  %v3712_v41 = vcombine.low %v1693_v28, %v1697_v29  ;;  %v3721_v43 = vcombine.high %v1701_v37, %v1705_v38 }
 0x87a   :  { %3297 = vmatprep.subr.bf16.mxu1 %v3657_v42  ;;  %v3719_v42 = vcombine.high %v1700_v35, %v1704_v36 }
 0x87c   :  { %3216 = vmatpush1.bf16.msra.mxu0 %v3654_v47  ;;  %v1713_v47 = vld [vmem:[#allocation2 + $0x7f8] sm:$0xff] }
 0x87d   :  { %3298 = vmatpush1.bf16.msra.mxu1 %v3656_v48  ;;  %3217 = vmatprep.subr.bf16.mxu0 %v3663_v49  ;;  %v3718_v48 = vcombine.low %v1700_v35, %v1704_v36  ;;  %v3720_v49 = vcombine.low %v1701_v37, %v1705_v38  ;;  %v3729_v50 = vcombine.high %v1709_v55, %v1713_v47 }
 0x87e   :  { %3299 = vmatprep.subr.bf16.mxu1 %v3665_v52  ;;  %v3727_v52 = vcombine.high %v1708_v44, %v1712_v51  ;;  %v3728_v57 = vcombine.low %v1709_v55, %v1713_v47 }
 0x880   :  { %3218 = vmatpush1.bf16.msra.mxu0 %v3662_v59  ;;  %v3337_v59 = vunpack.c.l.s4 %v4252_v58 }
 0x881   :  { %3300 = vmatpush1.bf16.msra.mxu1 %v3664_v60  ;;  %3219 = vmatprep.subr.bf16.mxu0 %v3671_v62  ;;  %v3339_v60 = vlaneseq }
 0x882   :  { %3301 = vmatprep.subr.bf16.mxu1 %v3673_v63  ;;  %v3338_v62 = vunpack.c.0.s8 %v3337_v59 }
 0x883   :  { %v3340_v63 = vshrl.u32 %v3339_v60, 7 }
 0x884   :  { %3220 = vmatpush1.bf16.msra.mxu0 %v3670_v4 }
 0x885   :  { %3302 = vmatpush1.bf16.msra.mxu1 %v3672_v5  ;;  %3221 = vmatprep.subr.bf16.mxu0 %v3679_v6  ;;  %v3341_v3 = vsub.s32 %v3338_v62, %v3340_v63 }
 0x886   :  { %3303 = vmatprep.subr.bf16.mxu1 %v3681_v7 }
 0x888   :  { %3222 = vmatpush1.bf16.msra.mxu0 %v3678_v12 }
 0x889   :  { %3304 = vmatpush1.bf16.msra.mxu1 %v3680_v13  ;;  %3223 = vmatprep.subr.bf16.mxu0 %v3687_v14 }
 0x88a   :  { %3305 = vmatprep.subr.bf16.mxu1 %v3689_v15 }
 0x88c   :  { %3224 = vmatpush1.bf16.msra.mxu0 %v3686_v46 }
 0x88d   :  { %3306 = vmatpush1.bf16.msra.mxu1 %v3688_v19  ;;  %3225 = vmatprep.subr.bf16.mxu0 %v3695_v20 }
 0x88e   :  { %3307 = vmatprep.subr.bf16.mxu1 %v3697_v21 }
 0x890   :  { %3226 = vmatpush1.bf16.msra.mxu0 %v3694_v53 }
 0x891   :  { %3308 = vmatpush1.bf16.msra.mxu1 %v3696_v54  ;;  %3227 = vmatprep.subr.bf16.mxu0 %v3703_v25 }
 0x892   :  { %3309 = vmatprep.subr.bf16.mxu1 %v3705_v26 }
 0x894   :  { %3228 = vmatpush1.bf16.msra.mxu0 %v3702_v31 }
 0x895   :  { %3310 = vmatpush1.bf16.msra.mxu1 %v3704_v32  ;;  %3229 = vmatprep.subr.bf16.mxu0 %v3711_v33 }
 0x896   :  { %3311 = vmatprep.subr.bf16.mxu1 %v3713_v34 }
 0x898   :  { %3230 = vmatpush1.bf16.msra.mxu0 %v3710_v39 }
 0x899   :  { %3312 = vmatpush1.bf16.msra.mxu1 %v3712_v41  ;;  %3231 = vmatprep.subr.bf16.mxu0 %v3719_v42 }
 0x89a   :  { %3313 = vmatprep.subr.bf16.mxu1 %v3721_v43 }
 0x89c   :  { %3232 = vmatpush1.bf16.msra.mxu0 %v3718_v48 }
 0x89d   :  { %3314 = vmatpush1.bf16.msra.mxu1 %v3720_v49  ;;  %3233 = vmatprep.subr.bf16.mxu0 %v3727_v52 }
 0x89e   :  { %3315 = vmatprep.subr.bf16.mxu1 %v3729_v50 }
 0x8a0   :  { %3234 = vmatpush1.bf16.msra.mxu0 %v3726_v30 }
 0x8a1   :  { %3316 = vmatpush1.bf16.msra.mxu1 %v3728_v57 }
 0x8a3   :  { %3236 = vmatmul.mubr.bf16.vlgmr.msra.gmra.mrb[28].mxu0 %v5022_v61 }
 0x8a4   :  { %3318 = vmatmul.mubr.bf16.vlgmr.msra.gmra.mrb[16].mxu1 %v5022_v61 }
 0x8f6   :  { %v3073_v1 = vpop.f32.mrb[24].mxu0  ;;  %v3155_v2 = vpop.f32.mrb[12].mxu1 }
 0x8f7   :  { %v3075_v40 = vpop.f32.mrb[25].mxu0  ;;  %v3157_v4 = vpop.f32.mrb[13].mxu1 }
 0x8f8   :  { %v3334_v5 = vcombine.low %v3073_v1, %v3075_v40  ;;  %v3335_v6 = vcombine.low %v3155_v2, %v3157_v4  ;;  %v3077_v7 = vpop.f32.mrb[26].mxu0  ;;  %v3159_v8 = vpop.f32.mrb[14].mxu1 }
 0x8f9   :  { %v3078_v9 = vpop.f32.mrb[27].mxu0  ;;  %v3160_v10 = vpop.f32.mrb[15].mxu1 }
 0x8fa   :  { %v3342_v11 = vrot.slane %v3334_v5, %v3341_v3  ;;  %v3349_v12 = vrot.slane %v3335_v6, %v3341_v3 }
 0x8fc   :  { %v3350_v13 = vcombine.low %v3342_v11, %v3349_v12 }
 0x8fe   :  { %3370 = vst [vmem:[#allocation5] sm:$0xff] %v3350_v13 }
 0x976   :  { %v3237_v61 = vpop.f32.mrb[28].mxu0 }
 0x977   :  { %v3319_v14 = vpop.f32.mrb[16].mxu1  ;;  %v3239_v15 = vpop.f32.mrb[29].mxu0 }
 0x978   :  { %v3351_v16 = vcombine.low %v3237_v61, %v3239_v15  ;;  %v3321_v17 = vpop.f32.mrb[17].mxu1  ;;  %v3241_v18 = vpop.f32.mrb[30].mxu0 }
 0x979   :  { %v3352_v45 = vcombine.low %v3319_v14, %v3321_v17  ;;  %v3323_v46 = vpop.f32.mrb[18].mxu1  ;;  %v3242_v19 = vpop.f32.mrb[31].mxu0 }
 0x97a   :  { %v3359_v20 = vrot.slane %v3351_v16, %v3341_v3  ;;  %v3324_v21 = vpop.f32.mrb[19].mxu1 }
 0x97b   :  { %v3366_v22 = vrot.slane %v3352_v45, %v3341_v3 }
 0x97d   :  { %v3367_v23 = vcombine.low %v3359_v20, %v3366_v22 }
 0x97f   :  { %3371 = vst [vmem:[#allocation5 + $0x8] sm:$0xff] %v3367_v23 }
 0x980   :  { %4230 = shalt.err (!%p4227_p12)
}
 0x981   :  { %s4231_s29 = scalar_lea.hbm %s5057_s11, 256 }
 0x982   :  { %p4232_p13 = scmp.ne.s32.totalorder %s5057_s11, %s4231_s29  ;;  %p4235_p0 = scmp.lt.u32.totalorder %s4231_s29, %s5057_s11 }
 0x984   :  { %p4237_p1 = pnand %p4235_p0, %p4232_p13 }
 0x986   :  { %4240 = shalt.err (!%p4237_p1)
}
 0x987   :  { %3381 = dma.vmem_to_hbm [thread:$0]  %s3379_s26, 256, %s5057_s11, [#allocation4]  }
 0x988   :  { %4243 = dma.done.wait [#allocation4], 256  }
 0x989   :  { %4244 = vsyncadd [#allocation4], 4294967040 }
 0x98a   :  { %3385 = vsyncpa [#allocation3], 1 }
 0x98b   :  { %3386 = vsyncpa [#allocation4], 1 }

</bundles_post_ra>
